<compile_context>
chip_gen: v7x
topology: tpu7x:2x2x1
jax: 0.10.0
libtpu: 0.0.40
codegen_flags: <defaults>
</compile_context>

<pallas_src>
import math

import jax
import jax.numpy as jnp
from jax.experimental import pallas as pl
from jax.experimental.pallas import tpu as pltpu


_MID_DIM = 64                 # mid_dim of every FullyConnectedLayer in the module
_NUM_CLASSES = (6, 5, 3)      # linear_1, linear_2, linear_3
_PAD = 128                    # lane-dense padded width of the fused head output
_INV_SQRT2 = 1.0 / math.sqrt(2.0)


def _pooled_multihead_kernel(feat_ref, w1_ref, b1_ref, w2_ref, b2_ref,
                             logits_ref, *emb_refs):
    # Global average pool over the spatial (sublane) axis: [TB, HW, D] -> [TB, D].
    # D sits on lanes, so the bulk of the reduce is elementwise vreg adds on the VPU.
    # Accumulate in f32 regardless of the feature dtype (bf16 sums would drift).
    hw = feat_ref.shape[1]
    emb = jnp.sum(feat_ref[...], axis=1, dtype=jnp.float32) * (1.0 / hw)

    if emb_refs:                                    # only materialized when div=True
        emb_refs[0][...] = emb.astype(emb_refs[0].dtype)

    # First linear of all three heads fused along the output axis: [TB, D] @ [D, 3*M].
    # Operands stay in their native dtype (bf16 runs the MXU at full rate);
    # accumulation is f32 via preferred_element_type.
    h = jnp.dot(emb.astype(w1_ref.dtype), w1_ref[...],
                preferred_element_type=jnp.float32)
    h = h + b1_ref[...].astype(jnp.float32)         # [1, 3*M] broadcasts over TB

    # Dropout(p=0.2): inference mode -> identity (see TODO above).

    # Exact GELU, matching torch.nn.GELU() default: 0.5*x*(1+erf(x/sqrt(2))).
    h = 0.5 * h * (1.0 + jax.lax.erf(h * _INV_SQRT2))

    # Second linear of all three heads as one block-diagonal, lane-padded weight:
    # [TB, 3*M] @ [3*M, 128]  (only columns 0..13 are real logits, rest are zero).
    logits = jnp.dot(h.astype(w2_ref.dtype), w2_ref[...],
                     preferred_element_type=jnp.float32)
    logits_ref[...] = (logits + b2_ref[...].astype(jnp.float32)).astype(logits_ref.dtype)


def _pack_head_params(params, dtype):
    """Fuse the 3 heads: concat first linears, block-diag + lane-pad second linears."""
    m = params["head_1"]["w1"].shape[1]
    w1 = jnp.concatenate([params[f"head_{i}"]["w1"] for i in (1, 2, 3)],
                         axis=1).astype(dtype)                       # [D, 3*M]
    b1 = jnp.concatenate([params[f"head_{i}"]["b1"] for i in (1, 2, 3)],
                         axis=0).reshape(1, 3 * m).astype(dtype)     # [1, 3*M]
    w2 = jnp.zeros((3 * m, _PAD), dtype)
    b2 = jnp.zeros((1, _PAD), dtype)
    col = 0
    for idx, nc in enumerate(_NUM_CLASSES):
        p = params[f"head_{idx + 1}"]
        w2 = w2.at[idx * m:(idx + 1) * m, col:col + nc].set(p["w2"].astype(dtype))
        b2 = b2.at[0, col:col + nc].set(p["b2"].astype(dtype))
        col += nc
    return w1, b1, w2, b2


def _sublane_multiple(dtype):
    """Sublane packing multiple: 8 (32-bit), 16 (16-bit), 32 (8-bit)."""
    return max(8, 32 // jnp.dtype(dtype).itemsize)


def _vmem_limit_bytes():
    """3/4 of physical VMEM: ~48 MiB on v7x (64 MiB), ~96 MiB on v5e/v6e (128 MiB)."""
    try:
        cap = int(pltpu.get_tpu_info().vmem_capacity_bytes)
    except Exception:
        cap = 64 << 20   # conservative fallback (v7x per-TensorCore VMEM)
    return max(32 << 20, (cap * 3) // 4)


def _choose_batch_tile(B, hw, D, dtype, vmem_limit, batch_tile=None):
    """Largest batch tile whose double-buffered feature slab fits the VMEM budget."""
    sub = _sublane_multiple(dtype)
    itemsize = jnp.dtype(dtype).itemsize
    budget = max(vmem_limit - (8 << 20), 4 << 20)    # headroom for weights/outputs/scratch
    tb = budget // (2 * hw * D * itemsize)           # feature input is double-buffered
    if batch_tile is not None:
        tb = min(tb, batch_tile)
    tb = min(tb, pl.cdiv(B, 2))                      # >= 2 grid steps -> both v7x TCs busy
    tb = (tb // sub) * sub                           # sublane-packed output blocks
    if tb < sub:
        tb = B                                       # batch too small to tile: grid=(1,)
    return int(min(tb, B))


def multi_head_forward(feat, params, *, div=False, channels_last=False, batch_tile=None):
    """Pallas forward of the post-backbone part of MultiHeadBaseModel.

    feat: backbone feature map, [B, D, H, W] (default, PyTorch NCHW) or
          [B, H, W, D] if channels_last=True (free reshape, no HBM transpose).
    Returns (logits_6, logits_5, logits_3) or (..., emb) if div=True.
    """
    if channels_last:
        B, H, W, D = feat.shape
        feat3 = feat.reshape(B, H * W, D)
    else:
        B, D, H, W = feat.shape
        # NCHW -> [B, HW, D] so D is lane-dense inside the kernel.  This costs one
        # HBM transpose pass; prefer channels_last=True if the backbone emits NHWC.
        feat3 = jnp.transpose(feat, (0, 2, 3, 1)).reshape(B, H * W, D)
    hw = H * W

    w1, b1, w2, b2 = _pack_head_params(params, feat.dtype)
    three_m = w1.shape[1]

    vmem_limit = _vmem_limit_bytes()
    tb = _choose_batch_tile(B, hw, D, feat.dtype, vmem_limit, batch_tile)
    grid = (pl.cdiv(B, tb),)

    itemsize = jnp.dtype(feat.dtype).itemsize
    param_bytes = (w1.size + b1.size + w2.size + b2.size) * itemsize
    out_bytes = B * _PAD * itemsize + (B * D * itemsize if div else 0)
    cost = pl.CostEstimate(
        flops=int(2 * B * hw * D + 2 * B * D * three_m + 2 * B * three_m * _PAD),
        transcendentals=int(B * three_m),
        bytes_accessed=int(B * hw * D * itemsize + param_bytes + out_bytes),
    )

    out_shape = [jax.ShapeDtypeStruct((B, _PAD), feat.dtype)]      # fused, lane-padded logits
    out_specs = [pl.BlockSpec((tb, _PAD), lambda i: (i, 0))]
    if div:
        out_shape.append(jax.ShapeDtypeStruct((B, D), feat.dtype))  # pooled embedding
        out_specs.append(pl.BlockSpec((tb, D), lambda i: (i, 0)))

    outs = pl.pallas_call(
        _pooled_multihead_kernel,
        out_shape=tuple(out_shape),
        grid_spec=pltpu.PrefetchScalarGridSpec(
            num_scalar_prefetch=0,
            grid=grid,
            in_specs=[
                pl.BlockSpec((tb, hw, D), lambda i: (i, 0, 0)),      # feature tile
                pl.BlockSpec((D, three_m), lambda i: (0, 0)),        # W1 (VMEM resident)
                pl.BlockSpec((1, three_m), lambda i: (0, 0)),        # b1
                pl.BlockSpec((three_m, _PAD), lambda i: (0, 0)),     # W2 (block-diag, padded)
                pl.BlockSpec((1, _PAD), lambda i: (0, 0)),           # b2
            ],
            out_specs=tuple(out_specs),
        ),
        compiler_params=pltpu.CompilerParams(
            dimension_semantics=("parallel",),    # batch tiles shard across v7x's 2 TCs
            vmem_limit_bytes=int(vmem_limit),
        ),
        cost_estimate=cost,
    )(feat3, w1, b1, w2, b2)

    logits_pad = outs[0]
    o1 = logits_pad[:, 0:_NUM_CLASSES[0]]
    o2 = logits_pad[:, _NUM_CLASSES[0]:_NUM_CLASSES[0] + _NUM_CLASSES[1]]
    o3 = logits_pad[:, _NUM_CLASSES[0] + _NUM_CLASSES[1]:sum(_NUM_CLASSES)]
    if div:
        return o1, o2, o3, outs[1]
    return o1, o2, o3


def init_params(key, in_dim, mid_dim=_MID_DIM, dtype=jnp.float32):
    """nn.Linear-style init (uniform +/- 1/sqrt(fan_in)) for the three heads."""
    params = {}
    head_keys = jax.random.split(key, len(_NUM_CLASSES))
    for idx, (nc, hk) in enumerate(zip(_NUM_CLASSES, head_keys), start=1):
        k1, k2, k3, k4 = jax.random.split(hk, 4)
        bound1 = 1.0 / math.sqrt(in_dim)
        bound2 = 1.0 / math.sqrt(mid_dim)
        params[f"head_{idx}"] = {
            "w1": jax.random.uniform(k1, (in_dim, mid_dim), dtype, -bound1, bound1),
            "b1": jax.random.uniform(k2, (mid_dim,), dtype, -bound1, bound1),
            "w2": jax.random.uniform(k3, (mid_dim, nc), dtype, -bound2, bound2),
            "b2": jax.random.uniform(k4, (nc,), dtype, -bound2, bound2),
        }
    return params


def _reference(feat, params):
    B, D, H, W = feat.shape
    emb = feat.reshape(B, D, H * W).mean(axis=-1)

    def head(p):
        h = emb @ p["w1"] + p["b1"]
        h = 0.5 * h * (1.0 + jax.lax.erf(h * _INV_SQRT2))
        return h @ p["w2"] + p["b2"]

    return head(params["head_1"]), head(params["head_2"]), head(params["head_3"]), emb


if __name__ == "__main__":
    # Small stand-in for the backbone feature map: D=128 plays the role of in_features.
    B, D, H, W = 32, 128, 16, 16

    key = jax.random.PRNGKey(0)
    kx, kp = jax.random.split(key)
    feat = jax.random.normal(kx, (B, D, H, W), dtype=jnp.float32)
    params = init_params(kp, D, _MID_DIM, dtype=jnp.float32)

    # f32 path, div=True: auto-derived batch tile (=> grid of 2 steps), strict parity.
    o1, o2, o3, emb = jax.block_until_ready(multi_head_forward(feat, params, div=True))
    r1, r2, r3, emb_ref = _reference(feat, params)

    assert o1.shape == (B, 6) and o2.shape == (B, 5) and o3.shape == (B, 3)
    assert emb.shape == (B, D)
    assert jnp.allclose(emb, emb_ref, atol=1e-4, rtol=1e-3), "emb mismatch"
    assert jnp.allclose(o1, r1, atol=1e-4, rtol=1e-3), "head_1 mismatch"
    assert jnp.allclose(o2, r2, atol=1e-4, rtol=1e-3), "head_2 mismatch"
    assert jnp.allclose(o3, r3, atol=1e-4, rtol=1e-3), "head_3 mismatch"

    # bf16 feature/weight path, div=False (emb output dropped; f32 accumulation inside).
    feat_bf16 = feat.astype(jnp.bfloat16)
    b1_, b2_, b3_ = jax.block_until_ready(
        multi_head_forward(feat_bf16, params, div=False))
    params_q = jax.tree_util.tree_map(
        lambda p: p.astype(jnp.bfloat16).astype(jnp.float32), params)
    rb1, rb2, rb3, _ = _reference(feat_bf16.astype(jnp.float32), params_q)
    assert jnp.allclose(b1_.astype(jnp.float32), rb1, atol=3e-2, rtol=3e-2), "bf16 head_1"
    assert jnp.allclose(b2_.astype(jnp.float32), rb2, atol=3e-2, rtol=3e-2), "bf16 head_2"
    assert jnp.allclose(b3_.astype(jnp.float32), rb3, atol=3e-2, rtol=3e-2), "bf16 head_3"

    print("KERNEL_OK")
</pallas_src>

<mosaic_0001>
module attributes {stable_mosaic.version = 11 : i64} {
  func.func @_pooled_multihead_kernel(%arg0: i32, %arg1: memref<16x256x128xf32, #tpu.memory_space<vmem>>, %arg2: memref<128x192xf32, #tpu.memory_space<vmem>>, %arg3: memref<1x192xf32, #tpu.memory_space<vmem>>, %arg4: memref<192x128xf32, #tpu.memory_space<vmem>>, %arg5: memref<1x128xf32, #tpu.memory_space<vmem>>, %arg6: memref<16x128xf32, #tpu.memory_space<vmem>>, %arg7: memref<16x128xf32, #tpu.memory_space<vmem>>) attributes {dimension_semantics = [#tpu.dimension_semantics<parallel>], iteration_bounds = array<i64: 2>, scalar_prefetch = 0 : i64, scratch_operands = 0 : i64, tpu.core_type = #tpu.core_type<tc>, window_params = [{transform_indices = @transform_0, window_bounds = array<i64: 16, 256, 128>}, {pipeline_mode = #tpu.pipeline_mode<synchronous>, transform_indices = @transform_1, window_bounds = array<i64: 128, 192>}, {pipeline_mode = #tpu.pipeline_mode<synchronous>, transform_indices = @transform_2, window_bounds = array<i64: 1, 192>}, {pipeline_mode = #tpu.pipeline_mode<synchronous>, transform_indices = @transform_3, window_bounds = array<i64: 192, 128>}, {pipeline_mode = #tpu.pipeline_mode<synchronous>, transform_indices = @transform_4, window_bounds = array<i64: 1, 128>}, {transform_indices = @transform_5, window_bounds = array<i64: 16, 128>}, {transform_indices = @transform_6, window_bounds = array<i64: 16, 128>}]} {
    %c0 = arith.constant 0 : index
    %c0_0 = arith.constant 0 : index
    %c0_1 = arith.constant 0 : index
    %0 = vector.load %arg1[%c0, %c0_0, %c0_1] : memref<16x256x128xf32, #tpu.memory_space<vmem>>, vector<16x256x128xf32>
    %cst = arith.constant dense<0.000000e+00> : vector<16x128xf32>
    %1 = vector.multi_reduction <add>, %0, %cst [1] : vector<16x256x128xf32> to vector<16x128xf32>
    %cst_2 = arith.constant 3.906250e-03 : f32
    %2 = vector.broadcast %cst_2 : f32 to vector<16x128xf32>
    %3 = arith.mulf %1, %2 : vector<16x128xf32>
    %c0_3 = arith.constant 0 : index
    %c0_4 = arith.constant 0 : index
    %4 = vector.load %arg7[%c0_3, %c0_4] : memref<16x128xf32, #tpu.memory_space<vmem>>, vector<16x128xf32>
    tpu.vector_store %arg7[%c0_3, %c0_4], %3 {strides = array<i32>} : memref<16x128xf32, #tpu.memory_space<vmem>>, vector<16x128xf32>,
    %c0_5 = arith.constant 0 : index
    %c0_6 = arith.constant 0 : index
    %5 = vector.load %arg2[%c0_5, %c0_6] : memref<128x192xf32, #tpu.memory_space<vmem>>, vector<128x192xf32>
    %cst_7 = arith.constant dense<0.000000e+00> : vector<16x192xf32>
    %6 = tpu.matmul %3, %5, %cst_7 {dimension_numbers = #tpu.dot_dimension_numbers<[1], [0], [0], [1], [0, 0, 1, 1], [], []>} : vector<16x128xf32>, vector<128x192xf32>, vector<16x192xf32> -> vector<16x192xf32>
    %c0_8 = arith.constant 0 : index
    %c0_9 = arith.constant 0 : index
    %7 = vector.load %arg3[%c0_8, %c0_9] : memref<1x192xf32, #tpu.memory_space<vmem>>, vector<1x192xf32>
    %8 = vector.broadcast %7 : vector<1x192xf32> to vector<16x192xf32>
    %9 = arith.addf %6, %8 : vector<16x192xf32>
    %cst_10 = arith.constant 5.000000e-01 : f32
    %10 = vector.broadcast %cst_10 : f32 to vector<16x192xf32>
    %11 = arith.mulf %10, %9 : vector<16x192xf32>
    %cst_11 = arith.constant 0.707106769 : f32
    %12 = vector.broadcast %cst_11 : f32 to vector<16x192xf32>
    %13 = arith.mulf %9, %12 : vector<16x192xf32>
    %14 = math.erf %13 : vector<16x192xf32>
    %cst_12 = arith.constant 1.000000e+00 : f32
    %15 = vector.broadcast %cst_12 : f32 to vector<16x192xf32>
    %16 = arith.addf %15, %14 : vector<16x192xf32>
    %17 = arith.mulf %11, %16 : vector<16x192xf32>
    %c0_13 = arith.constant 0 : index
    %c0_14 = arith.constant 0 : index
    %18 = vector.load %arg4[%c0_13, %c0_14] : memref<192x128xf32, #tpu.memory_space<vmem>>, vector<192x128xf32>
    %cst_15 = arith.constant dense<0.000000e+00> : vector<16x128xf32>
    %19 = tpu.matmul %17, %18, %cst_15 {dimension_numbers = #tpu.dot_dimension_numbers<[1], [0], [0], [1], [0, 0, 1, 1], [], []>} : vector<16x192xf32>, vector<192x128xf32>, vector<16x128xf32> -> vector<16x128xf32>
    %c0_16 = arith.constant 0 : index
    %c0_17 = arith.constant 0 : index
    %20 = vector.load %arg5[%c0_16, %c0_17] : memref<1x128xf32, #tpu.memory_space<vmem>>, vector<1x128xf32>
    %21 = vector.broadcast %20 : vector<1x128xf32> to vector<16x128xf32>
    %22 = arith.addf %19, %21 : vector<16x128xf32>
    %c0_18 = arith.constant 0 : index
    %c0_19 = arith.constant 0 : index
    %23 = vector.load %arg6[%c0_18, %c0_19] : memref<16x128xf32, #tpu.memory_space<vmem>>, vector<16x128xf32>
    tpu.vector_store %arg6[%c0_18, %c0_19], %22 {strides = array<i32>} : memref<16x128xf32, #tpu.memory_space<vmem>>, vector<16x128xf32>,
    return
  }
  func.func @transform_0(%arg0: i32) -> (i32, i32, i32) {
    %c0_i32 = arith.constant 0 : i32
    %c0_i32_0 = arith.constant 0 : i32
    %c0_i32_1 = arith.constant 0 : i32
    return %arg0, %c0_i32, %c0_i32_0 : i32, i32, i32
  }
  func.func @transform_1(%arg0: i32) -> (i32, i32) {
    %c0_i32 = arith.constant 0 : i32
    %c0_i32_0 = arith.constant 0 : i32
    %c0_i32_1 = arith.constant 0 : i32
    return %c0_i32, %c0_i32_0 : i32, i32
  }
  func.func @transform_2(%arg0: i32) -> (i32, i32) {
    %c0_i32 = arith.constant 0 : i32
    %c0_i32_0 = arith.constant 0 : i32
    %c0_i32_1 = arith.constant 0 : i32
    return %c0_i32, %c0_i32_0 : i32, i32
  }
  func.func @transform_3(%arg0: i32) -> (i32, i32) {
    %c0_i32 = arith.constant 0 : i32
    %c0_i32_0 = arith.constant 0 : i32
    %c0_i32_1 = arith.constant 0 : i32
    return %c0_i32, %c0_i32_0 : i32, i32
  }
  func.func @transform_4(%arg0: i32) -> (i32, i32) {
    %c0_i32 = arith.constant 0 : i32
    %c0_i32_0 = arith.constant 0 : i32
    %c0_i32_1 = arith.constant 0 : i32
    return %c0_i32, %c0_i32_0 : i32, i32
  }
  func.func @transform_5(%arg0: i32) -> (i32, i32) {
    %c0_i32 = arith.constant 0 : i32
    %c0_i32_0 = arith.constant 0 : i32
    return %arg0, %c0_i32 : i32, i32
  }
  func.func @transform_6(%arg0: i32) -> (i32, i32) {
    %c0_i32 = arith.constant 0 : i32
    %c0_i32_0 = arith.constant 0 : i32
    return %arg0, %c0_i32 : i32, i32
  }
}

</mosaic_0001>

<bundles_post_ra>
// kernel: tpu_custom_call.1
= control target key start
LH: loop header
LB: loop body
LE: loop exit
PB: predicated region body
PF: predicated region fallthrough
CT: control target
= control target key end

     0   :  { %12 = vsyncpa [#allocation3], 0  ;;  %s3336_s0 = inlined_call_operand.hbm [shape: f32[32,256,128], index: 0, kind: input, shape index: {}]   ;;  %s3337_s1 = inlined_call_operand.vmem [shape: f32[128,192], index: 1, kind: input, shape index: {}]   ;;  %s3338_s2 = inlined_call_operand.hbm [shape: f32[1,192], index: 2, kind: input, shape index: {}]   ;;  %s3339_s3 = inlined_call_operand.hbm [shape: f32[192,128], index: 3, kind: input, shape index: {}]   ;;  %s3340_s4 = inlined_call_operand.hbm [shape: f32[1,128], index: 4, kind: input, shape index: {}]   ;;  %s3341_s5 = inlined_call_operand.hbm [shape: f32[32,128], index: 5, kind: output, shape index: {0}]   ;;  %s3342_s6 = inlined_call_operand.hbm [shape: f32[32,128], index: 6, kind: output, shape index: {1}]  }
   0x1   :  { %14 = vsyncpa [#allocation3 + $0x1], 0 }
   0x2   :  { %15 = vsyncpa [#allocation6], 0 }
   0x3   :  { %16 = vsyncpa [#allocation9], 0 }
   0x4   :  { %17 = vsyncpa [#allocation4], 0 }
   0x5   :  { %19 = vsyncpa [#allocation4 + $0x1], 0 }
   0x6   :  { %20 = vsyncpa [#allocation12], 0 }
   0x7   :  { %22 = vsyncpa [#allocation12 + $0x1], 0  ;;  %s2376_s21 = smov 0   ;;  %s2378_s22 = smov 0  }
   0x8   :  { %s2380_s23 = smov 0   ;;  %s2382_s24 = smov 0  }
   0x9 LB: > { %s2397_s25 = sadd.s32 4294967295, %s2327_s24   ;;  %s1911_s26 = sadd.s32 4294967294, %s2327_s24   ;;  %s2327_s24 = sphi %s2382_s24, %s3365_s24   ;;  %s2323_s23 = sphi %s2380_s23, %s3364_s23   ;;  %s2319_s22 = sphi %s2378_s22, %s3363_s22   ;;  %s2315_s21 = sphi %s2376_s21, %s3362_s21  }
   0xa   : > { %p48_p0 = scmp.ne.s32.totalorder %s2319_s22, %s2315_s21  ;;  %p3343_p1 = scmp.eq.s32.totalorder %s2397_s25, 0 }
   0xb   : > { %p162_p3 = scmp.eq.s32.totalorder %s1911_s26, 1  ;;  %p1912_p5 = scmp.ge.s32.totalorder %s2327_s24, 1 }
   0xc   : > { %p2406_p4 = por %p3343_p1, %p48_p0  ;;  %p195_p7 = scmp.lt.s32.totalorder %s2327_s24, 3 }
   0xd   : > { %p2411_p6 = por %p162_p3, %p48_p0  ;;  %s2329_s30 = smov [#allocation5]  }
   0xe   : > { %s3346_s27 = scalar_select %p2406_p4, 1, 0 }
   0xf   : > { %s3347_s28 = scalar_select %p2411_p6, 1, 0 }
  0x10   : > { %p2416_p8 = pnand %p1912_p5, %p195_p7  ;;  %s211_s7 = sshll.u32 %s2329_s30, 4  ;;  %s212_s7 = int_to_ptr.vmem [resolvable:$true] %s211_s7 }
  0x11   : > { %s2330_s8 = smov [#allocation7]   ;;  %s2331_s11 = smov [#allocation8]  }
  0x12   : > { %s3348_s29 = scalar_select %p2416_p8, 1, 0 }
  0x13   : > { %p2029_p10 = pneg %p2416_p8  ;;  %s221_s9 = sshll.u32 %s2330_s8, 4  ;;  %s2429_s9 = int_to_ptr.vmem [resolvable:$true] %s221_s9 }
  0x14   : > { %s2431_s12 = sshll.u32 %s2331_s11, 4  ;;  %s2107_s15 = scalar_lea.hbm %s3338_s2, 32  ;;  %s236_s12 = int_to_ptr.vmem [resolvable:$true] %s2431_s12 }
  0x15   : > { %p2425_p11 = pnand %p2029_p10, %p3343_p1  ;;  %p2108_p12 = scmp.ne.s32.totalorder %s3338_s2, %s2107_s15 }
  0x16   : > { %p2114_p5 = scmp.lt.u32.totalorder %s2107_s15, %s3338_s2 }
  0x17   : > { %p2441_p13 = pneg %p2425_p11 }
  0x19   : > { %p2110_p0 = pnand %p2441_p13, %p2108_p12 }
  0x1b   : > { %p2111_p3 = pneg %p2110_p0 }
  0x1d   : > { %p2116_p7 = pnand %p2114_p5, %p2111_p3 }
  0x1f   : > { %2119 = shalt.err (!%p2116_p7)
}
  0x20   : > { %s2120_s26 = scalar_lea.vmem %s212_s7, 32  ;;  %p2128_p2 = scmp.lt.s32.totalorder %s212_s7, %s212_s7 }
  0x21   : > { %p2121_p10 = scmp.ne.s32.totalorder %s212_s7, %s2120_s26  ;;  %p2129_p6 = scmp.lt.s32.totalorder %s2120_s26, %s2120_s26 }
  0x23   : > { %p2123_p9 = pnand %p2121_p10, %p2441_p13  ;;  %p2130_p4 = por %p2129_p6, %p2128_p2 }
  0x25   : > { %p2124_p1 = pneg %p2123_p9 }
  0x27   : > { %p2131_p8 = pnand %p2130_p4, %p2124_p1 }
  0x29   : > { %2134 = shalt.err (!%p2131_p8)
}
  0x2a   : > { %2032 = dma.hbm_to_vmem [thread:$0]  (!%p2425_p11), %s3338_s2, 32, %s212_s7, [#allocation6]  }
  0x2b   : > { %s2135_s14 = scalar_lea.hbm %s3339_s3, 3072 }
  0x2c   : > { %p2136_p9 = scmp.ne.s32.totalorder %s3339_s3, %s2135_s14  ;;  %p2142_p1 = scmp.lt.u32.totalorder %s2135_s14, %s3339_s3 }
  0x2e   : > { %p2138_p12 = pnand %p2136_p9, %p2441_p13 }
  0x30   : > { %p2139_p2 = pneg %p2138_p12 }
  0x32   : > { %p2144_p4 = pnand %p2142_p1, %p2139_p2 }
  0x34   : > { %2147 = shalt.err (!%p2144_p4)
}
  0x35   : > { %s2148_s7 = scalar_lea.vmem %s2429_s9, 3072  ;;  %p2156_p3 = scmp.lt.s32.totalorder %s2429_s9, %s2429_s9 }
  0x36   : > { %p2149_p6 = scmp.ne.s32.totalorder %s2429_s9, %s2148_s7  ;;  %p2157_p5 = scmp.lt.s32.totalorder %s2148_s7, %s2148_s7 }
  0x38   : > { %p2151_p8 = pnand %p2149_p6, %p2441_p13  ;;  %p2158_p7 = por %p2157_p5, %p2156_p3 }
  0x3a   : > { %p2152_p0 = pneg %p2151_p8 }
  0x3c   : > { %p2159_p10 = pnand %p2158_p7, %p2152_p0 }
  0x3e   : > { %2162 = shalt.err (!%p2159_p10)
}
  0x3f   : > { %s2332_s20 = smov 128   ;;  %s2333_s26 = smov 8  }
  0x40   : > { %2035 = dma.hbm_to_vmem [thread:$0]  (!%p2425_p11), %s3339_s3, 3072, %s2429_s9, [#allocation6], %s2332_s20, %s2332_s20, %s2333_s26  }
  0x41   : > { %s2163_s14 = scalar_lea.hbm %s3340_s4, 16 }
  0x42   : > { %p2164_p9 = scmp.ne.s32.totalorder %s3340_s4, %s2163_s14  ;;  %p2170_p1 = scmp.lt.u32.totalorder %s2163_s14, %s3340_s4 }
  0x44   : > { %p2166_p12 = pnand %p2164_p9, %p2441_p13 }
  0x46   : > { %p2167_p2 = pneg %p2166_p12 }
  0x48   : > { %p2172_p4 = pnand %p2170_p1, %p2167_p2 }
  0x4a   : > { %2175 = shalt.err (!%p2172_p4)
}
  0x4b   : > { %s2176_s7 = scalar_lea.vmem %s236_s12, 16  ;;  %s2183_s9 = scalar_lea.vmem %s236_s12, 32 }
  0x4c   : > { %p2177_p6 = scmp.ne.s32.totalorder %s236_s12, %s2176_s7  ;;  %p2184_p3 = scmp.lt.s32.totalorder %s236_s12, %s236_s12 }
  0x4d   : > { %p2185_p5 = scmp.lt.s32.totalorder %s2183_s9, %s2176_s7 }
  0x4e   : > { %p2179_p8 = pnand %p2177_p6, %p2441_p13 }
  0x4f   : > { %p2186_p7 = por %p2185_p5, %p2184_p3 }
  0x50   : > { %p2180_p0 = pneg %p2179_p8 }
  0x52   : > { %p2187_p10 = pnand %p2186_p7, %p2180_p0 }
  0x54   : > { %2190 = shalt.err (!%p2187_p10)
}
  0x55   : > { %2038 = dma.hbm_to_vmem [thread:$0]  (!%p2425_p11), %s3340_s4, 16, %s236_s12, [#allocation9]  }
  0x56   : > { %s2503_s18 = sadd.s32 1, %s2327_s24   ;;  %s35_s10 = sadd.s32 1, %s2323_s23 }
  0x57   : > { %s32_s11 = ssub.s32 %s2327_s24, %s2503_s18  ;;  %p42_p9 = scmp.ne.s32.totalorder %s2323_s23, %s2319_s22 }
  0x58   : > { %p33_p13 = scmp.eq.s32.totalorder %s32_s11, 0  ;;  %p43_p12 = scmp.eq.s32.totalorder %s2327_s24, 0 }
  0x59   : > { %p2053_p2 = scmp.lt.s32.totalorder %s2327_s24, 2  ;;  %p3351_p4 = scmp.eq.s32.totalorder %s2397_s25, 1 }
  0x5a   : > { %s2513_s13 = scalar_select %p33_p13, %s2323_s23, %s35_s10  }
  0x5b   : > { %p44_p1 = por %p43_p12, %p42_p9  ;;  %p2517_p6 = por %p3351_p4, %p42_p9 }
  0x5c   : > { %s246_s15 = sand.u32 1, %s2323_s23   ;;  %s1940_s16 = sshll.u32 %s2327_s24, 16 }
  0x5d   : > { %s1917_s12 = sshll.u32 %s246_s15, 12  ;;  %s2526_s7 = scalar_lea.hbm %s3336_s0, %s1940_s16 }
  0x5e   : > { %s250_s9 = scalar_lea.vmem [#allocation2], %s1917_s12  ;;  %p2528_p11 = pnand %p2053_p2, %p44_p1 }
  0x5f   : > { %s258_s30 = sshll.u32 %s250_s9, 4  ;;  %s2534_s11 = scalar_lea.sflag [#allocation3], %s246_s15  ;;  %s2532_s30 = int_to_ptr.vmem [resolvable:$true] %s258_s30 }
  0x60   : > { %s2191_s10 = scalar_lea.hbm %s2526_s7, 65536  ;;  %p2193_p0 = pneg %p2528_p11 }
  0x61   : > { %p2192_p8 = scmp.ne.s32.totalorder %s2526_s7, %s2191_s10  ;;  %s2196_s17 = scalar_lea.hbm %s3336_s0, 131072 }
  0x62   : > { %p2197_p7 = scmp.lt.u32.totalorder %s2526_s7, %s3336_s0  ;;  %p2198_p10 = scmp.lt.u32.totalorder %s2196_s17, %s2191_s10 }
  0x63   : > { %p2194_p3 = pnand %p2193_p0, %p2192_p8  ;;  %p2200_p9 = scmp.lt.u32.totalorder %s2191_s10, %s2526_s7 }
  0x64   : > { %p2199_p13 = por %p2198_p10, %p2197_p7 }
  0x65   : > { %p2195_p5 = pneg %p2194_p3 }
  0x66   : > { %p2201_p12 = por %p2200_p9, %p2199_p13 }
  0x68   : > { %p2202_p2 = pnand %p2201_p12, %p2195_p5 }
  0x6a   : > { %2205 = shalt.err (!%p2202_p2)
}
  0x6b   : > { %s2206_s15 = scalar_lea.vmem %s2532_s30, 65536  ;;  %s2334_s16 = smov [#allocation2]  }
  0x6c   : > { %p2207_p1 = scmp.ne.s32.totalorder %s2532_s30, %s2206_s15  ;;  %s2211_s12 = sshll.u32 %s2334_s16, 4  ;;  %s2212_s12 = int_to_ptr.vmem [resolvable:$false] %s2211_s12 }
  0x6d   : > { %s2213_s19 = scalar_lea.vmem %s2212_s12, 131072  ;;  %p2214_p3 = scmp.lt.s32.totalorder %s2532_s30, %s2212_s12 }
  0x6e   : > { %p2209_p4 = pnand %p2207_p1, %p2193_p0  ;;  %p2215_p7 = scmp.lt.s32.totalorder %s2213_s19, %s2206_s15 }
  0x70   : > { %p2210_p8 = pneg %p2209_p4  ;;  %p2216_p10 = por %p2215_p7, %p2214_p3 }
  0x72   : > { %p2217_p13 = pnand %p2216_p10, %p2210_p8 }
  0x74   : > { %2220 = shalt.err (!%p2217_p13)
}
  0x75   : > { %2042 = dma.hbm_to_vmem [thread:$0]  (!%p2528_p11), %s2526_s7, 65536, %s2532_s30, %s2534_s11, %s2332_s20, %s2332_s20, %s2333_s26  }
  0x76   : > { %p3354_p0 = scmp.ne.s32.totalorder %s3348_s29, 0 }
  0x77   : > { %s2568_s10 = sand.u32 (!%p3354_p0), 1, %s2319_s22   ;;  %p3355_p5 = scmp.ne.s32.totalorder (!%p3354_p0), %s3346_s27, 0 }
  0x78   : > { %270 = sbr.rel (%p3354_p0) target bundleno = 820 (0x334), region = 40  ;;  %s1922_s17 = sshll.u32 (!%p3354_p0), %s2568_s10, 12 }
  0x79   : > { %s273_s9 = scalar_lea.sflag (!%p3354_p0), [#allocation3], %s2568_s10  ;;  %s2572_s15 = scalar_lea.vmem (!%p3354_p0), [#allocation2], %s1922_s17 }
  0x7f   : > { %2294 = dma.done.wait (%p3355_p5), %s273_s9, 65536  }
  0x80   : > { %2296 = vsyncadd (%p3355_p5), %s273_s9, 4294901760  ;;  %p3356_p11 = scmp.eq.s32.totalorder %s2397_s25, 0 }
  0x82   : > { %2298 = dma.done.wait (%p3356_p11), [#allocation6], 3104   ;;  %p3357_p9 = pmov %p3356_p11 }
  0x84   : > { %2300 = vsyncadd (%p3357_p9), [#allocation6], 4294964192  ;;  %p3358_p12 = pmov %p3357_p9 }
  0x85   : > { %p3359_p2 = pmov %p3357_p9 }
  0x86   : > { %2302 = dma.done.wait (%p3358_p12), [#allocation9], 16  }
  0x87   : > { %2304 = vsyncadd (%p3359_p2), [#allocation9], 4294967280  ;;  %v2335_v0 = vmov 0.0   ;;  %v1487_v1 = vld [vmem:[%s3337_s1 + $0x8] sm:$0xff]  ;;  %v1489_v2 = vld [vmem:[%s3337_s1 + $0x18] sm:$0xff]  ;;  %vm1461_vm0 = vcmask 1041409  }
  0x88   : > { %1594 = vmatprep.mubr.f32.mxu0 %v2335_v0  ;;  %v1486_v3 = vld [vmem:[%s3337_s1] sm:$0xff]  ;;  %v1943_v4 = vpack.c.bf16 %v1489_v2, %v1487_v1  ;;  %v1488_v5 = vld [vmem:[%s3337_s1 + $0x10] sm:$0xff]  ;;  %v1491_v6 = vld [vmem:[%s3337_s1 + $0x28] sm:$0xff]  ;;  %vm1463_vm1 = vcmask 1042434   ;;  %vm1465_vm2 = vcmask 1043459   ;;  %vm1467_vm3 = vcmask 1044484  }
  0x89   : > { %v1493_v7 = vld [vmem:[%s3337_s1 + $0x38] sm:$0xff]  ;;  %v1945_v8 = vpack.c.bf16 %v1488_v5, %v1486_v3  ;;  %v1490_v10 = vld [vmem:[%s3337_s1 + $0x20] sm:$0xff]  ;;  %v1492_v11 = vld [vmem:[%s3337_s1 + $0x30] sm:$0xff]  ;;  %vm1469_vm4 = vcmask 1045509   ;;  %vm1471_vm5 = vcmask 1046534   ;;  %s1926_s9 = sshll.u32 %s2568_s10, 4 }
  0x8a   : > { %v1947_v9 = vpack.c.bf16 %v1493_v7, %v1491_v6  ;;  %v1495_v12 = vld [vmem:[%s3337_s1 + $0x48] sm:$0xff]  ;;  %1944 = vmatprep.subr.bf16.mxu0 %v1943_v4  ;;  %v1497_v13 = vld [vmem:[%s3337_s1 + $0x58] sm:$0xff]  ;;  %v1949_v14 = vpack.c.bf16 %v1492_v11, %v1490_v10  ;;  %v1494_v16 = vld [vmem:[%s3337_s1 + $0x40] sm:$0xff]  ;;  %vm1473_vm6 = vcmask 1047559   ;;  %s3077_s29 = scalar_lea.vmem [#allocation11], %s1926_s9  ;;  %vm1658_vm7 = vcmask 523264  }
  0x8b   : > { %1946 = vmatpush1.bf16.msra.mxu0 %v1945_v8  ;;  %v1951_v15 = vpack.c.bf16 %v1497_v13, %v1495_v12  ;;  %v1496_v17 = vld [vmem:[%s3337_s1 + $0x50] sm:$0xff]  ;;  %v1499_v18 = vld [vmem:[%s3337_s1 + $0x68] sm:$0xff]  ;;  %v1501_v19 = vld [vmem:[%s3337_s1 + $0x78] sm:$0xff]  ;;  %s1941_s20 = sshll.u32 %s2397_s25, 8  ;;  %s1748_s30 = scalar_lea.sflag [#allocation12], %s2568_s10 }
  0x8c   : > { %1948 = vmatprep.subr.bf16.mxu0 %v1947_v9  ;;  %v1953_v20 = vpack.c.bf16 %v1496_v17, %v1494_v16  ;;  %v1955_v21 = vpack.c.bf16 %v1501_v19, %v1499_v18  ;;  %v1498_v22 = vld [vmem:[%s3337_s1 + $0x60] sm:$0xff]  ;;  %v1500_v23 = vld [vmem:[%s3337_s1 + $0x70] sm:$0xff]  ;;  %v1503_v24 = vld [vmem:[%s3337_s1 + $0x88] sm:$0xff]  ;;  %s3251_s7 = scalar_lea.hbm %s3342_s6, %s1941_s20  ;;  %s2337_s11 = smov [#allocation11]  }
  0x8d   : > { %v1505_v25 = vld [vmem:[%s3337_s1 + $0x98] sm:$0xff]  ;;  %v325_v26 = vld [vmem:[%s2572_s15] sm:$0xff]  ;;  %v326_v27 = vld [vmem:[%s2572_s15 + $0x8] sm:$0xff]  ;;  %v1957_v29 = vpack.c.bf16 %v1500_v23, %v1498_v22  ;;  %s2225_s16 = sshll.u32 %s2337_s11, 4  ;;  %s2226_s16 = int_to_ptr.vmem [resolvable:$false] %s2225_s16 }
  0x8e   : > { %v327_v28 = vld [vmem:[%s2572_s15 + $0x10] sm:$0xff]  ;;  %v837_v30 = vadd.f32 %v326_v27, %v325_v26  ;;  %v1959_v31 = vpack.c.bf16 %v1505_v25, %v1503_v24  ;;  %v1502_v32 = vld [vmem:[%s3337_s1 + $0x80] sm:$0xff]  ;;  %v328_v34 = vld [vmem:[%s2572_s15 + $0x18] sm:$0xff]  ;;  %s2227_s12 = scalar_lea.vmem %s2226_s16, 512 }
  0x8f   : > { %1950 = vmatpush1.bf16.msra.mxu0 %v1949_v14  ;;  %v1504_v33 = vld [vmem:[%s3337_s1 + $0x90] sm:$0xff]  ;;  %v1507_v35 = vld [vmem:[%s3337_s1 + $0xa8] sm:$0xff]  ;;  %v1509_v36 = vld [vmem:[%s3337_s1 + $0xb8] sm:$0xff] }
  0x90   : > { %1952 = vmatprep.subr.bf16.mxu0 %v1951_v15  ;;  %v838_v37 = vadd.f32 %v837_v30, %v327_v28  ;;  %v329_v38 = vld [vmem:[%s2572_s15 + $0x20] sm:$0xff]  ;;  %v1961_v39 = vpack.c.bf16 %v1504_v33, %v1502_v32  ;;  %v1963_v41 = vpack.c.bf16 %v1509_v36, %v1507_v35  ;;  %v1508_v43 = vld [vmem:[%s3337_s1 + $0xb0] sm:$0xff]  ;;  %v330_v44 = vld [vmem:[%s2572_s15 + $0x28] sm:$0xff] }
  0x91   : > { %v1506_v42 = vld [vmem:[%s3337_s1 + $0xa0] sm:$0xff]  ;;  %v1511_v45 = vld [vmem:[%s3337_s1 + $0xc8] sm:$0xff]  ;;  %v1513_v46 = vld [vmem:[%s3337_s1 + $0xd8] sm:$0xff] }
  0x92   : > { %v839_v40 = vadd.f32 %v838_v37, %v328_v34  ;;  %v331_v48 = vld [vmem:[%s2572_s15 + $0x30] sm:$0xff]  ;;  %v1965_v49 = vpack.c.bf16 %v1508_v43, %v1506_v42  ;;  %v1510_v50 = vld [vmem:[%s3337_s1 + $0xc0] sm:$0xff]  ;;  %v1967_v53 = vpack.c.bf16 %v1513_v46, %v1511_v45  ;;  %v332_v54 = vld [vmem:[%s2572_s15 + $0x38] sm:$0xff] }
  0x93   : > { %1954 = vmatpush1.bf16.msra.mxu0 %v1953_v20  ;;  %v1512_v51 = vld [vmem:[%s3337_s1 + $0xd0] sm:$0xff]  ;;  %v357_v55 = vld [vmem:[%s2572_s15 + $0x100] sm:$0xff]  ;;  %v358_v56 = vld [vmem:[%s2572_s15 + $0x108] sm:$0xff] }
  0x94   : > { %1956 = vmatprep.subr.bf16.mxu0 %v1955_v21  ;;  %v840_v47 = vadd.f32 %v839_v40, %v329_v38  ;;  %v1515_v57 = vld [vmem:[%s3337_s1 + $0xe8] sm:$0xff]  ;;  %v1517_v58 = vld [vmem:[%s3337_s1 + $0xf8] sm:$0xff]  ;;  %v359_v59 = vld [vmem:[%s2572_s15 + $0x110] sm:$0xff]  ;;  %v874_v61 = vadd.f32 %v358_v56, %v357_v55  ;;  %v1969_v1 = vpack.c.bf16 %v1512_v51, %v1510_v50 }
  0x95   : > { %v333_v62 = vld [vmem:[%s2572_s15 + $0x40] sm:$0xff]  ;;  %v360_v63 = vld [vmem:[%s2572_s15 + $0x118] sm:$0xff]  ;;  %v1971_v5 = vpack.c.bf16 %v1517_v58, %v1515_v57  ;;  %v1516_v6 = vld [vmem:[%s3337_s1 + $0xf0] sm:$0xff] }
  0x96   : > { %v841_v52 = vadd.f32 %v840_v47, %v330_v44  ;;  %v1514_v2 = vld [vmem:[%s3337_s1 + $0xe0] sm:$0xff]  ;;  %v875_v4 = vadd.f32 %v874_v61, %v359_v59  ;;  %v334_v7 = vld [vmem:[%s2572_s15 + $0x48] sm:$0xff]  ;;  %v335_v11 = vld [vmem:[%s2572_s15 + $0x50] sm:$0xff] }
  0x97   : > { %1958 = vmatpush1.bf16.msra.mxu0 %v1957_v29  ;;  %v361_v8 = vld [vmem:[%s2572_s15 + $0x120] sm:$0xff]  ;;  %v362_v12 = vld [vmem:[%s2572_s15 + $0x128] sm:$0xff]  ;;  %v1973_v13 = vpack.c.bf16 %v1516_v6, %v1514_v2  ;;  %v336_v16 = vld [vmem:[%s2572_s15 + $0x58] sm:$0xff] }
  0x98   : > { %1960 = vmatprep.subr.bf16.mxu0 %v1959_v31  ;;  %v842_v60 = vadd.f32 %v841_v52, %v331_v48  ;;  %v876_v10 = vadd.f32 %v875_v4, %v360_v63  ;;  %v363_v17 = vld [vmem:[%s2572_s15 + $0x130] sm:$0xff]  ;;  %v337_v20 = vld [vmem:[%s2572_s15 + $0x60] sm:$0xff]  ;;  %v364_v21 = vld [vmem:[%s2572_s15 + $0x138] sm:$0xff] }
  0x99   : > { %v389_v22 = vld [vmem:[%s2572_s15 + $0x200] sm:$0xff]  ;;  %v390_v23 = vld [vmem:[%s2572_s15 + $0x208] sm:$0xff]  ;;  %v391_v24 = vld [vmem:[%s2572_s15 + $0x210] sm:$0xff] }
  0x9a   : > { %v843_v3 = vadd.f32 %v842_v60, %v332_v54  ;;  %v877_v15 = vadd.f32 %v876_v10, %v361_v8  ;;  %v338_v27 = vld [vmem:[%s2572_s15 + $0x68] sm:$0xff]  ;;  %v365_v28 = vld [vmem:[%s2572_s15 + $0x140] sm:$0xff]  ;;  %v911_v29 = vadd.f32 %v390_v23, %v389_v22  ;;  %v392_v30 = vld [vmem:[%s2572_s15 + $0x218] sm:$0xff] }
  0x9b   : > { %1962 = vmatpush1.bf16.msra.mxu0 %v1961_v39  ;;  %v339_v33 = vld [vmem:[%s2572_s15 + $0x70] sm:$0xff]  ;;  %v366_v34 = vld [vmem:[%s2572_s15 + $0x148] sm:$0xff]  ;;  %v393_v36 = vld [vmem:[%s2572_s15 + $0x220] sm:$0xff] }
  0x9c   : > { %1964 = vmatprep.subr.bf16.mxu0 %v1963_v41  ;;  %v844_v9 = vadd.f32 %v843_v3, %v333_v62  ;;  %v878_v19 = vadd.f32 %v877_v15, %v362_v12  ;;  %v912_v35 = vadd.f32 %v911_v29, %v391_v24  ;;  %v340_v39 = vld [vmem:[%s2572_s15 + $0x78] sm:$0xff]  ;;  %v367_v40 = vld [vmem:[%s2572_s15 + $0x150] sm:$0xff]  ;;  %v394_v42 = vld [vmem:[%s2572_s15 + $0x228] sm:$0xff] }
  0x9d   : > { %v341_v45 = vld [vmem:[%s2572_s15 + $0x80] sm:$0xff]  ;;  %v368_v46 = vld [vmem:[%s2572_s15 + $0x158] sm:$0xff]  ;;  %v395_v48 = vld [vmem:[%s2572_s15 + $0x230] sm:$0xff] }
  0x9e   : > { %v845_v14 = vadd.f32 %v844_v9, %v334_v7  ;;  %v879_v26 = vadd.f32 %v878_v19, %v363_v17  ;;  %v913_v41 = vadd.f32 %v912_v35, %v392_v30  ;;  %v342_v51 = vld [vmem:[%s2572_s15 + $0x88] sm:$0xff]  ;;  %v369_v52 = vld [vmem:[%s2572_s15 + $0x160] sm:$0xff]  ;;  %v343_v54 = vld [vmem:[%s2572_s15 + $0x90] sm:$0xff] }
  0x9f   : > { %1966 = vmatpush1.bf16.msra.mxu0 %v1965_v49  ;;  %v396_v55 = vld [vmem:[%s2572_s15 + $0x238] sm:$0xff]  ;;  %v421_v56 = vld [vmem:[%s2572_s15 + $0x300] sm:$0xff]  ;;  %v370_v59 = vld [vmem:[%s2572_s15 + $0x168] sm:$0xff] }
  0xa0   : > { %1968 = vmatprep.subr.bf16.mxu0 %v1967_v53  ;;  %v846_v18 = vadd.f32 %v845_v14, %v335_v11  ;;  %v880_v32 = vadd.f32 %v879_v26, %v364_v21  ;;  %v914_v47 = vadd.f32 %v913_v41, %v393_v36  ;;  %v422_v60 = vld [vmem:[%s2572_s15 + $0x308] sm:$0xff]  ;;  %v423_v61 = vld [vmem:[%s2572_s15 + $0x310] sm:$0xff]  ;;  %v397_v63 = vld [vmem:[%s2572_s15 + $0x240] sm:$0xff] }
  0xa1   : > { %v948_v3 = vadd.f32 %v422_v60, %v421_v56  ;;  %v371_v4 = vld [vmem:[%s2572_s15 + $0x170] sm:$0xff]  ;;  %v344_v7 = vld [vmem:[%s2572_s15 + $0x98] sm:$0xff]  ;;  %v398_v8 = vld [vmem:[%s2572_s15 + $0x248] sm:$0xff] }
  0xa2   : > { %v847_v25 = vadd.f32 %v846_v18, %v336_v16  ;;  %v881_v38 = vadd.f32 %v880_v32, %v365_v28  ;;  %v915_v53 = vadd.f32 %v914_v47, %v394_v42  ;;  %v372_v12 = vld [vmem:[%s2572_s15 + $0x178] sm:$0xff]  ;;  %v399_v15 = vld [vmem:[%s2572_s15 + $0x250] sm:$0xff]  ;;  %v373_v18 = vld [vmem:[%s2572_s15 + $0x180] sm:$0xff] }
  0xa3   : > { %1970 = vmatpush1.bf16.msra.mxu0 %v1969_v1  ;;  %v949_v11 = vadd.f32 %v948_v3, %v423_v61  ;;  %v426_v19 = vld [vmem:[%s2572_s15 + $0x328] sm:$0xff]  ;;  %v345_v22 = vld [vmem:[%s2572_s15 + $0xa0] sm:$0xff]  ;;  %v400_v23 = vld [vmem:[%s2572_s15 + $0x258] sm:$0xff] }
  0xa4   : > { %1972 = vmatprep.subr.bf16.mxu0 %v1971_v5  ;;  %v848_v31 = vadd.f32 %v847_v25, %v337_v20  ;;  %v882_v44 = vadd.f32 %v881_v38, %v366_v34  ;;  %v916_v62 = vadd.f32 %v915_v53, %v395_v48  ;;  %v424_v5 = vld [vmem:[%s2572_s15 + $0x318] sm:$0xff]  ;;  %v374_v26 = vld [vmem:[%s2572_s15 + $0x188] sm:$0xff]  ;;  %v375_v29 = vld [vmem:[%s2572_s15 + $0x190] sm:$0xff] }
  0xa5   : > { %v950_v17 = vadd.f32 %v949_v11, %v424_v5  ;;  %v401_v30 = vld [vmem:[%s2572_s15 + $0x260] sm:$0xff]  ;;  %v454_v35 = vld [vmem:[%s2572_s15 + $0x408] sm:$0xff]  ;;  %v403_v48 = vld [vmem:[%s2572_s15 + $0x270] sm:$0xff] }
  0xa6   : > { %v849_v37 = vadd.f32 %v848_v31, %v338_v27  ;;  %v883_v50 = vadd.f32 %v882_v44, %v367_v40  ;;  %v917_v6 = vadd.f32 %v916_v62, %v396_v55  ;;  %v427_v27 = vld [vmem:[%s2572_s15 + $0x330] sm:$0xff]  ;;  %v453_v34 = vld [vmem:[%s2572_s15 + $0x400] sm:$0xff]  ;;  %v346_v38 = vld [vmem:[%s2572_s15 + $0xa8] sm:$0xff] }
  0xa7   : > { %1974 = vmatpush1.bf16.msra.mxu0 %v1973_v13  ;;  %v425_v13 = vld [vmem:[%s2572_s15 + $0x320] sm:$0xff]  ;;  %v455_v40 = vld [vmem:[%s2572_s15 + $0x410] sm:$0xff]  ;;  %v376_v44 = vld [vmem:[%s2572_s15 + $0x198] sm:$0xff] }
  0xa8   : > { %v850_v43 = vadd.f32 %v849_v37, %v339_v33  ;;  %v884_v58 = vadd.f32 %v883_v50, %v368_v46  ;;  %v918_v14 = vadd.f32 %v917_v6, %v397_v63  ;;  %v951_v25 = vadd.f32 %v950_v17, %v425_v13  ;;  %v428_v33 = vld [vmem:[%s2572_s15 + $0x338] sm:$0xff]  ;;  %v430_v53 = vld [vmem:[%s2572_s15 + $0x348] sm:$0xff]  ;;  %v431_v62 = vld [vmem:[%s2572_s15 + $0x350] sm:$0xff] }
  0xa9   : > { %v456_v46 = vld [vmem:[%s2572_s15 + $0x418] sm:$0xff]  ;;  %v458_v63 = vld [vmem:[%s2572_s15 + $0x428] sm:$0xff] }
  0xaa   : > { %v851_v49 = vadd.f32 %v850_v43, %v340_v39  ;;  %v885_v2 = vadd.f32 %v884_v58, %v369_v52  ;;  %v919_v21 = vadd.f32 %v918_v14, %v398_v8  ;;  %v952_v32 = vadd.f32 %v951_v25, %v426_v19  ;;  %v402_v39 = vld [vmem:[%s2572_s15 + $0x268] sm:$0xff]  ;;  %v377_v52 = vld [vmem:[%s2572_s15 + $0x1a0] sm:$0xff]  ;;  %v404_v58 = vld [vmem:[%s2572_s15 + $0x278] sm:$0xff] }
  0xab   : > { %v985_v43 = vadd.f32 %v454_v35, %v453_v34  ;;  %v378_v6 = vld [vmem:[%s2572_s15 + $0x1a8] sm:$0xff]  ;;  %v459_v8 = vld [vmem:[%s2572_s15 + $0x430] sm:$0xff]  ;;  %v348_v11 = vld [vmem:[%s2572_s15 + $0xb8] sm:$0xff] }
  0xac   : > { %v852_v57 = vadd.f32 %v851_v49, %v341_v45  ;;  %v886_v10 = vadd.f32 %v885_v2, %v370_v59  ;;  %v920_v28 = vadd.f32 %v919_v21, %v399_v15  ;;  %v953_v42 = vadd.f32 %v952_v32, %v427_v27  ;;  %v429_v45 = vld [vmem:[%s2572_s15 + $0x340] sm:$0xff]  ;;  %v407_v15 = vld [vmem:[%s2572_s15 + $0x290] sm:$0xff]  ;;  %v460_v17 = vld [vmem:[%s2572_s15 + $0x438] sm:$0xff] }
  0xad   : > { %v405_v2 = vld [vmem:[%s2572_s15 + $0x280] sm:$0xff]  ;;  %v487_v21 = vld [vmem:[%s2572_s15 + $0x510] sm:$0xff]  ;;  %v408_v32 = vld [vmem:[%s2572_s15 + $0x298] sm:$0xff] }
  0xae   : > { %v853_v1 = vadd.f32 %v852_v57, %v342_v51  ;;  %v887_v16 = vadd.f32 %v886_v10, %v371_v4  ;;  %v921_v37 = vadd.f32 %v920_v28, %v400_v23  ;;  %v954_v50 = vadd.f32 %v953_v42, %v428_v33  ;;  %v347_v57 = vld [vmem:[%s2572_s15 + $0xb0] sm:$0xff]  ;;  %v485_v19 = vld [vmem:[%s2572_s15 + $0x500] sm:$0xff]  ;;  %v488_v33 = vld [vmem:[%s2572_s15 + $0x518] sm:$0xff] }
  0xaf   : > { %v986_v51 = vadd.f32 %v985_v43, %v455_v40  ;;  %v379_v25 = vld [vmem:[%s2572_s15 + $0x1b0] sm:$0xff]  ;;  %v461_v27 = vld [vmem:[%s2572_s15 + $0x440] sm:$0xff] }
  0xb0   : > { %v854_v9 = vadd.f32 %v853_v1, %v343_v54  ;;  %v888_v24 = vadd.f32 %v887_v16, %v372_v12  ;;  %v922_v47 = vadd.f32 %v921_v37, %v401_v30  ;;  %v457_v54 = vld [vmem:[%s2572_s15 + $0x420] sm:$0xff]  ;;  %v955_v60 = vadd.f32 %v954_v50, %v429_v45  ;;  %v406_v12 = vld [vmem:[%s2572_s15 + $0x288] sm:$0xff]  ;;  %v380_v45 = vld [vmem:[%s2572_s15 + $0x1b8] sm:$0xff] }
  0xb1   : > { %v987_v61 = vadd.f32 %v986_v51, %v456_v46  ;;  %v433_v16 = vld [vmem:[%s2572_s15 + $0x360] sm:$0xff]  ;;  %v462_v37 = vld [vmem:[%s2572_s15 + $0x448] sm:$0xff]  ;;  %v436_v46 = vld [vmem:[%s2572_s15 + $0x378] sm:$0xff] }
  0xb2   : > { %v855_v20 = vadd.f32 %v854_v9, %v344_v7  ;;  %v889_v31 = vadd.f32 %v888_v24, %v373_v18  ;;  %v923_v56 = vadd.f32 %v922_v47, %v402_v39  ;;  %v956_v4 = vadd.f32 %v955_v60, %v430_v53  ;;  %v432_v7 = vld [vmem:[%s2572_s15 + $0x358] sm:$0xff]  ;;  %v409_v40 = vld [vmem:[%s2572_s15 + $0x2a0] sm:$0xff]  ;;  %v463_v47 = vld [vmem:[%s2572_s15 + $0x450] sm:$0xff] }
  0xb3   : > { %v988_v5 = vadd.f32 %v987_v61, %v457_v54  ;;  %v350_v51 = vld [vmem:[%s2572_s15 + $0xc8] sm:$0xff]  ;;  %v351_v60 = vld [vmem:[%s2572_s15 + $0xd0] sm:$0xff] }
  0xb4   : > { %v856_v36 = vadd.f32 %v855_v20, %v345_v22  ;;  %v890_v41 = vadd.f32 %v889_v31, %v374_v26  ;;  %v924_v1 = vadd.f32 %v923_v56, %v403_v48  ;;  %v957_v13 = vadd.f32 %v956_v4, %v431_v62  ;;  %v486_v20 = vld [vmem:[%s2572_s15 + $0x508] sm:$0xff]  ;;  %v349_v31 = vld [vmem:[%s2572_s15 + $0xc0] sm:$0xff]  ;;  %v411_v61 = vld [vmem:[%s2572_s15 + $0x2b0] sm:$0xff] }
  0xb5   : > { %v989_v14 = vadd.f32 %v988_v5, %v458_v63  ;;  %v434_v26 = vld [vmem:[%s2572_s15 + $0x368] sm:$0xff]  ;;  %v1022_v30 = vadd.f32 %v486_v20, %v485_v19  ;;  %v437_v56 = vld [vmem:[%s2572_s15 + $0x380] sm:$0xff]  ;;  %v491_v62 = vld [vmem:[%s2572_s15 + $0x530] sm:$0xff] }
  0xb6   : > { %v891_v49 = vadd.f32 %v890_v41, %v375_v29  ;;  %v857_v55 = vadd.f32 %v856_v36, %v346_v38  ;;  %v925_v10 = vadd.f32 %v924_v1, %v404_v58  ;;  %v958_v23 = vadd.f32 %v957_v13, %v432_v7  ;;  %v435_v36 = vld [vmem:[%s2572_s15 + $0x370] sm:$0xff]  ;;  %v489_v41 = vld [vmem:[%s2572_s15 + $0x520] sm:$0xff]  ;;  %v490_v53 = vld [vmem:[%s2572_s15 + $0x528] sm:$0xff] }
  0xb7   : > { %v990_v24 = vadd.f32 %v989_v14, %v459_v8  ;;  %v1023_v39 = vadd.f32 %v1022_v30, %v487_v21  ;;  %v438_v4 = vld [vmem:[%s2572_s15 + $0x388] sm:$0xff]  ;;  %v465_v5 = vld [vmem:[%s2572_s15 + $0x460] sm:$0xff]  ;;  %v439_v14 = vld [vmem:[%s2572_s15 + $0x390] sm:$0xff] }
  0xb8   : > { %v892_v59 = vadd.f32 %v891_v49, %v376_v44  ;;  %v858_v9 = vadd.f32 %v857_v55, %v347_v57  ;;  %v926_v18 = vadd.f32 %v925_v10, %v405_v2  ;;  %v959_v34 = vadd.f32 %v958_v23, %v433_v16  ;;  %v464_v57 = vld [vmem:[%s2572_s15 + $0x458] sm:$0xff]  ;;  %v518_v16 = vld [vmem:[%s2572_s15 + $0x608] sm:$0xff]  ;;  %v493_v19 = vld [vmem:[%s2572_s15 + $0x540] sm:$0xff] }
  0xb9   : > { %v991_v35 = vadd.f32 %v990_v24, %v460_v17  ;;  %v1024_v50 = vadd.f32 %v1023_v39, %v488_v33  ;;  %v492_v10 = vld [vmem:[%s2572_s15 + $0x538] sm:$0xff]  ;;  %v519_v20 = vld [vmem:[%s2572_s15 + $0x610] sm:$0xff]  ;;  %v382_v24 = vld [vmem:[%s2572_s15 + $0x1c8] sm:$0xff] }
  0xba   : > { %v893_v3 = vadd.f32 %v892_v59, %v377_v52  ;;  %v859_v28 = vadd.f32 %v858_v9, %v348_v11  ;;  %v927_v29 = vadd.f32 %v926_v18, %v406_v12  ;;  %v960_v43 = vadd.f32 %v959_v34, %v434_v26  ;;  %v410_v52 = vld [vmem:[%s2572_s15 + $0x2a8] sm:$0xff]  ;;  %v412_v9 = vld [vmem:[%s2572_s15 + $0x2b8] sm:$0xff]  ;;  %v517_v11 = vld [vmem:[%s2572_s15 + $0x600] sm:$0xff] }
  0xbb   : > { %v992_v44 = vadd.f32 %v991_v35, %v461_v27  ;;  %v1025_v59 = vadd.f32 %v1024_v50, %v489_v41  ;;  %v467_v26 = vld [vmem:[%s2572_s15 + $0x470] sm:$0xff]  ;;  %v352_v30 = vld [vmem:[%s2572_s15 + $0xd8] sm:$0xff] }
  0xbc   : > { %v894_v22 = vadd.f32 %v893_v3, %v378_v6  ;;  %v928_v38 = vadd.f32 %v927_v29, %v407_v15  ;;  %v860_v48 = vadd.f32 %v859_v28, %v349_v31  ;;  %v961_v54 = vadd.f32 %v960_v43, %v435_v36  ;;  %v381_v3 = vld [vmem:[%s2572_s15 + $0x1c0] sm:$0xff]  ;;  %v466_v15 = vld [vmem:[%s2572_s15 + $0x468] sm:$0xff]  ;;  %v495_v41 = vld [vmem:[%s2572_s15 + $0x550] sm:$0xff] }
  0xbd   : > { %v993_v55 = vadd.f32 %v992_v44, %v462_v37  ;;  %v1026_v8 = vadd.f32 %v1025_v59, %v490_v53  ;;  %v1059_v29 = vadd.f32 %v518_v16, %v517_v11  ;;  %v494_v31 = vld [vmem:[%s2572_s15 + $0x548] sm:$0xff]  ;;  %v413_v36 = vld [vmem:[%s2572_s15 + $0x2c0] sm:$0xff]  ;;  %v496_v53 = vld [vmem:[%s2572_s15 + $0x558] sm:$0xff] }
  0xbe   : > { %v895_v42 = vadd.f32 %v894_v22, %v379_v25  ;;  %v929_v49 = vadd.f32 %v928_v38, %v408_v32  ;;  %v962_v1 = vadd.f32 %v961_v54, %v436_v46  ;;  %v861_v6 = vadd.f32 %v860_v48, %v350_v51  ;;  %v440_v25 = vld [vmem:[%s2572_s15 + $0x398] sm:$0xff]  ;;  %v441_v37 = vld [vmem:[%s2572_s15 + $0x3a0] sm:$0xff]  ;;  %v383_v46 = vld [vmem:[%s2572_s15 + $0x1d0] sm:$0xff] }
  0xbf   : > { %v994_v2 = vadd.f32 %v993_v55, %v463_v47  ;;  %v1027_v18 = vadd.f32 %v1026_v8, %v491_v62  ;;  %v520_v32 = vld [vmem:[%s2572_s15 + $0x618] sm:$0xff]  ;;  %v442_v47 = vld [vmem:[%s2572_s15 + $0x3a8] sm:$0xff]  ;;  %v469_v48 = vld [vmem:[%s2572_s15 + $0x480] sm:$0xff] }
  0xc0   : > { %v930_v58 = vadd.f32 %v929_v49, %v409_v40  ;;  %v896_v63 = vadd.f32 %v895_v42, %v380_v45  ;;  %v963_v12 = vadd.f32 %v962_v1, %v437_v56  ;;  %v862_v27 = vadd.f32 %v861_v6, %v351_v60  ;;  %v468_v38 = vld [vmem:[%s2572_s15 + $0x478] sm:$0xff]  ;;  %v521_v42 = vld [vmem:[%s2572_s15 + $0x620] sm:$0xff]  ;;  %v522_v54 = vld [vmem:[%s2572_s15 + $0x628] sm:$0xff] }
  0xc1   : > { %v995_v13 = vadd.f32 %v994_v2, %v464_v57  ;;  %v1028_v28 = vadd.f32 %v1027_v18, %v492_v10  ;;  %v1060_v40 = vadd.f32 %v1059_v29, %v519_v20  ;;  %v414_v59 = vld [vmem:[%s2572_s15 + $0x2c8] sm:$0xff]  ;;  %v443_v60 = vld [vmem:[%s2572_s15 + $0x3b0] sm:$0xff]  ;;  %v444_v2 = vld [vmem:[%s2572_s15 + $0x3b8] sm:$0xff] }
  0xc2   : > { %v931_v7 = vadd.f32 %v930_v58, %v410_v52  ;;  %v897_v21 = vadd.f32 %v896_v63, %v381_v3  ;;  %v964_v22 = vadd.f32 %v963_v12, %v438_v4  ;;  %v863_v49 = vadd.f32 %v862_v27, %v352_v30  ;;  %v353_v52 = vld [vmem:[%s2572_s15 + $0xe0] sm:$0xff]  ;;  %v384_v58 = vld [vmem:[%s2572_s15 + $0x1d8] sm:$0xff]  ;;  %v354_v1 = vld [vmem:[%s2572_s15 + $0xe8] sm:$0xff] }
  0xc3   : > { %v996_v23 = vadd.f32 %v995_v13, %v465_v5  ;;  %v1029_v39 = vadd.f32 %v1028_v28, %v493_v19  ;;  %v1061_v51 = vadd.f32 %v1060_v40, %v520_v32  ;;  %v497_v3 = vld [vmem:[%s2572_s15 + $0x560] sm:$0xff]  ;;  %v523_v4 = vld [vmem:[%s2572_s15 + $0x630] sm:$0xff]  ;;  %v550_v11 = vld [vmem:[%s2572_s15 + $0x708] sm:$0xff] }
  0xc4   : > { %v932_v17 = vadd.f32 %v931_v7, %v411_v61  ;;  %v965_v34 = vadd.f32 %v964_v22, %v439_v14  ;;  %v898_v43 = vadd.f32 %v897_v21, %v382_v24  ;;  %v470_v61 = vld [vmem:[%s2572_s15 + $0x488] sm:$0xff]  ;;  %v415_v8 = vld [vmem:[%s2572_s15 + $0x2d0] sm:$0xff]  ;;  %v549_v10 = vld [vmem:[%s2572_s15 + $0x700] sm:$0xff]  ;;  %v864_v12 = vadd.f32 %v863_v49, %v353_v52 }
  0xc5   : > { %v997_v35 = vadd.f32 %v996_v23, %v466_v15  ;;  %v1030_v50 = vadd.f32 %v1029_v39, %v494_v31  ;;  %v1062_v63 = vadd.f32 %v1061_v51, %v521_v42  ;;  %v498_v15 = vld [vmem:[%s2572_s15 + $0x568] sm:$0xff]  ;;  %v524_v16 = vld [vmem:[%s2572_s15 + $0x638] sm:$0xff]  ;;  %v1096_v21 = vadd.f32 %v550_v11, %v549_v10  ;;  %v445_v22 = vld [vmem:[%s2572_s15 + $0x3c0] sm:$0xff] }
  0xc6   : > { %v933_v33 = vadd.f32 %v932_v17, %v412_v9  ;;  %v966_v44 = vadd.f32 %v965_v34, %v440_v25  ;;  %v899_v5 = vadd.f32 %v898_v43, %v383_v46  ;;  %v471_v9 = vld [vmem:[%s2572_s15 + $0x490] sm:$0xff]  ;;  %v472_v23 = vld [vmem:[%s2572_s15 + $0x498] sm:$0xff]  ;;  %v385_v27 = vld [vmem:[%s2572_s15 + $0x1e0] sm:$0xff] }
  0xc7   : > { %v998_v45 = vadd.f32 %v997_v35, %v467_v26  ;;  %v1031_v62 = vadd.f32 %v1030_v50, %v495_v41  ;;  %v1063_v14 = vadd.f32 %v1062_v63, %v522_v54  ;;  %v551_v17 = vld [vmem:[%s2572_s15 + $0x710] sm:$0xff]  ;;  %v552_v24 = vld [vmem:[%s2572_s15 + $0x718] sm:$0xff]  ;;  %v525_v29 = vld [vmem:[%s2572_s15 + $0x640] sm:$0xff] }
  0xc8   : > { %v934_v55 = vadd.f32 %v933_v33, %v413_v36  ;;  %v967_v56 = vadd.f32 %v966_v44, %v441_v37  ;;  %v499_v28 = vld [vmem:[%s2572_s15 + $0x570] sm:$0xff]  ;;  %v900_v30 = vadd.f32 %v899_v5, %v384_v58  ;;  %v1097_v33 = vadd.f32 %v1096_v21, %v551_v17  ;;  %v446_v34 = vld [vmem:[%s2572_s15 + $0x3c8] sm:$0xff]  ;;  %v473_v35 = vld [vmem:[%s2572_s15 + $0x4a0] sm:$0xff] }
  0xc9   : > { %v999_v57 = vadd.f32 %v998_v45, %v468_v38  ;;  %v1032_v13 = vadd.f32 %v1031_v62, %v496_v53  ;;  %v1064_v26 = vadd.f32 %v1063_v14, %v523_v4  ;;  %v553_v36 = vld [vmem:[%s2572_s15 + $0x720] sm:$0xff]  ;;  %v865_v37 = vadd.f32 %v864_v12, %v354_v1  ;;  %v355_v40 = vld [vmem:[%s2572_s15 + $0xf0] sm:$0xff]  ;;  %v500_v41 = vld [vmem:[%s2572_s15 + $0x578] sm:$0xff] }
  0xca   : > { %v968_v6 = vadd.f32 %v967_v56, %v442_v47  ;;  %v935_v18 = vadd.f32 %v934_v55, %v414_v59  ;;  %v526_v42 = vld [vmem:[%s2572_s15 + $0x648] sm:$0xff]  ;;  %v1098_v46 = vadd.f32 %v1097_v33, %v552_v24  ;;  %v447_v53 = vld [vmem:[%s2572_s15 + $0x3d0] sm:$0xff]  ;;  %v501_v54 = vld [vmem:[%s2572_s15 + $0x580] sm:$0xff]  ;;  %v901_v56 = vadd.f32 %v900_v30, %v385_v27 }
  0xcb   : > { %v1000_v7 = vadd.f32 %v999_v57, %v469_v48  ;;  %v1033_v25 = vadd.f32 %v1032_v13, %v497_v3  ;;  %v1065_v39 = vadd.f32 %v1064_v26, %v524_v16  ;;  %v386_v47 = vld [vmem:[%s2572_s15 + $0x1e8] sm:$0xff]  ;;  %v416_v48 = vld [vmem:[%s2572_s15 + $0x2d8] sm:$0xff]  ;;  %v527_v55 = vld [vmem:[%s2572_s15 + $0x650] sm:$0xff] }
  0xcc   : > { %v969_v19 = vadd.f32 %v968_v6, %v443_v60  ;;  %v936_v43 = vadd.f32 %v935_v18, %v415_v8  ;;  %v474_v49 = vld [vmem:[%s2572_s15 + $0x4a8] sm:$0xff]  ;;  %v1099_v59 = vadd.f32 %v1098_v46, %v553_v36  ;;  %v356_v60 = vld [vmem:[%s2572_s15 + $0xf8] sm:$0xff]  ;;  %v475_v62 = vld [vmem:[%s2572_s15 + $0x4b0] sm:$0xff]  ;;  %v902_v18 = vadd.f32 %v901_v56, %v386_v47 }
  0xcd   : > { %v1001_v20 = vadd.f32 %v1000_v7, %v470_v61  ;;  %v1034_v38 = vadd.f32 %v1033_v25, %v498_v15  ;;  %v554_v50 = vld [vmem:[%s2572_s15 + $0x728] sm:$0xff]  ;;  %v1066_v52 = vadd.f32 %v1065_v39, %v525_v29  ;;  %v417_v61 = vld [vmem:[%s2572_s15 + $0x2e0] sm:$0xff]  ;;  %v555_v63 = vld [vmem:[%s2572_s15 + $0x730] sm:$0xff]  ;;  %v866_v7 = vadd.f32 %v865_v37, %v355_v40 }
  0xce   : > { %v970_v31 = vadd.f32 %v969_v19, %v444_v2  ;;  %v448_v3 = vld [vmem:[%s2572_s15 + $0x3d8] sm:$0xff]  ;;  %v502_v5 = vld [vmem:[%s2572_s15 + $0x588] sm:$0xff]  ;;  %v937_v8 = vadd.f32 %v936_v43, %v416_v48  ;;  %v1100_v10 = vadd.f32 %v1099_v59, %v554_v50  ;;  %v387_v11 = vld [vmem:[%s2572_s15 + $0x1f0] sm:$0xff] }
  0xcf   : > { %v1002_v32 = vadd.f32 %v1001_v20, %v471_v9  ;;  %v1035_v51 = vadd.f32 %v1034_v38, %v499_v28  ;;  %v1067_v2 = vadd.f32 %v1066_v52, %v526_v42  ;;  %v476_v4 = vld [vmem:[%s2572_s15 + $0x4b8] sm:$0xff]  ;;  %v503_v12 = vld [vmem:[%s2572_s15 + $0x590] sm:$0xff]  ;;  %v529_v13 = vld [vmem:[%s2572_s15 + $0x660] sm:$0xff]  ;;  %v903_v47 = vadd.f32 %v902_v18, %v387_v11 }
  0xd0   : > { %v971_v44 = vadd.f32 %v970_v31, %v445_v22  ;;  %v528_v6 = vld [vmem:[%s2572_s15 + $0x658] sm:$0xff]  ;;  %v1101_v20 = vadd.f32 %v1100_v10, %v555_v63  ;;  %v581_v21 = vld [vmem:[%s2572_s15 + $0x800] sm:$0xff]  ;;  %v582_v22 = vld [vmem:[%s2572_s15 + $0x808] sm:$0xff]  ;;  %v938_v33 = vadd.f32 %v937_v8, %v417_v61 }
  0xd1   : > { %v1003_v45 = vadd.f32 %v1002_v32, %v472_v23  ;;  %v1036_v1 = vadd.f32 %v1035_v51, %v500_v41  ;;  %v556_v14 = vld [vmem:[%s2572_s15 + $0x738] sm:$0xff]  ;;  %v1068_v17 = vadd.f32 %v1067_v2, %v527_v55  ;;  %v583_v23 = vld [vmem:[%s2572_s15 + $0x810] sm:$0xff]  ;;  %v418_v24 = vld [vmem:[%s2572_s15 + $0x2e8] sm:$0xff]  ;;  %v1133_v29 = vadd.f32 %v582_v22, %v581_v21 }
  0xd2   : > { %v972_v57 = vadd.f32 %v971_v44, %v446_v34  ;;  %v477_v25 = vld [vmem:[%s2572_s15 + $0x4c0] sm:$0xff]  ;;  %v504_v30 = vld [vmem:[%s2572_s15 + $0x598] sm:$0xff]  ;;  %v530_v31 = vld [vmem:[%s2572_s15 + $0x668] sm:$0xff]  ;;  %v867_v32 = vadd.f32 %v866_v7, %v356_v60  ;;  %v939_v60 = vadd.f32 %v938_v33, %v418_v24 }
  0xd3   : > { %v1004_v58 = vadd.f32 %v1003_v45, %v473_v35  ;;  %v1037_v16 = vadd.f32 %v1036_v1, %v501_v54  ;;  %v557_v26 = vld [vmem:[%s2572_s15 + $0x740] sm:$0xff]  ;;  %v1069_v28 = vadd.f32 %v1068_v17, %v528_v6  ;;  %v1102_v35 = vadd.f32 %v1101_v20, %v556_v14  ;;  %v584_v36 = vld [vmem:[%s2572_s15 + $0x818] sm:$0xff]  ;;  %v478_v39 = vld [vmem:[%s2572_s15 + $0x4c8] sm:$0xff] }
  0xd4   : > { %v973_v15 = vadd.f32 %v972_v57, %v447_v53  ;;  %v388_v37 = vld [vmem:[%s2572_s15 + $0x1f8] sm:$0xff]  ;;  %v449_v38 = vld [vmem:[%s2572_s15 + $0x3e0] sm:$0xff]  ;;  %v558_v40 = vld [vmem:[%s2572_s15 + $0x748] sm:$0xff]  ;;  %v1134_v44 = vadd.f32 %v1133_v29, %v583_v23  ;;  %v868_v59 = vrot.slane %v867_v32, 4 }
  0xd5   : > { %v1005_v9 = vadd.f32 %v1004_v58, %v474_v49  ;;  %v1038_v27 = vadd.f32 %v1037_v16, %v502_v5  ;;  %v1070_v43 = vadd.f32 %v1069_v28, %v529_v13  ;;  %v505_v45 = vld [vmem:[%s2572_s15 + $0x5a0] sm:$0xff]  ;;  %v531_v46 = vld [vmem:[%s2572_s15 + $0x670] sm:$0xff]  ;;  %v1103_v49 = vadd.f32 %v1102_v35, %v557_v26  ;;  %v506_v57 = vld [vmem:[%s2572_s15 + $0x5a8] sm:$0xff] }
  0xd6   : > { %v974_v41 = vadd.f32 %v973_v15, %v448_v3  ;;  %v585_v50 = vld [vmem:[%s2572_s15 + $0x820] sm:$0xff]  ;;  %v419_v51 = vld [vmem:[%s2572_s15 + $0x2f0] sm:$0xff]  ;;  %v1135_v56 = vadd.f32 %v1134_v44, %v584_v36  ;;  %v532_v58 = vld [vmem:[%s2572_s15 + $0x678] sm:$0xff]  ;;  %v904_v10 = vadd.f32 %v903_v47, %v388_v37  ;;  %v869_v23 = vadd.f32 %v868_v59, %v867_v32 }
  0xd7   : > { %v1006_v19 = vadd.f32 %v1005_v9, %v475_v62  ;;  %v1039_v42 = vadd.f32 %v1038_v27, %v503_v12  ;;  %v479_v52 = vld [vmem:[%s2572_s15 + $0x4d0] sm:$0xff]  ;;  %v1071_v55 = vadd.f32 %v1070_v43, %v530_v31  ;;  %v1104_v62 = vadd.f32 %v1103_v49, %v558_v40  ;;  %v586_v63 = vld [vmem:[%s2572_s15 + $0x828] sm:$0xff]  ;;  %v480_v2 = vld [vmem:[%s2572_s15 + $0x4d8] sm:$0xff] }
  0xd8   : > { %v559_v53 = vld [vmem:[%s2572_s15 + $0x750] sm:$0xff]  ;;  %v450_v1 = vld [vmem:[%s2572_s15 + $0x3e8] sm:$0xff]  ;;  %v560_v3 = vld [vmem:[%s2572_s15 + $0x758] sm:$0xff]  ;;  %v1136_v7 = vadd.f32 %v1135_v56, %v585_v50  ;;  %v940_v24 = vadd.f32 %v939_v60, %v419_v51  ;;  %v870_v51 = vrot.slane %v869_v23, 2 }
  0xd9   : > { %v1007_v34 = vadd.f32 %v1006_v19, %v476_v4  ;;  %v1040_v54 = vadd.f32 %v1039_v42, %v504_v30  ;;  %v975_v4 = vadd.f32 %v974_v41, %v449_v38  ;;  %v1072_v6 = vadd.f32 %v1071_v55, %v531_v46  ;;  %v507_v8 = vld [vmem:[%s2572_s15 + $0x5b0] sm:$0xff]  ;;  %v533_v9 = vld [vmem:[%s2572_s15 + $0x680] sm:$0xff]  ;;  %v420_v14 = vld [vmem:[%s2572_s15 + $0x2f8] sm:$0xff] }
  0xda   : > { %v1105_v12 = vadd.f32 %v1104_v62, %v559_v53  ;;  %v587_v13 = vld [vmem:[%s2572_s15 + $0x830] sm:$0xff]  ;;  %v481_v15 = vld [vmem:[%s2572_s15 + $0x4e0] sm:$0xff]  ;;  %v508_v16 = vld [vmem:[%s2572_s15 + $0x5b8] sm:$0xff]  ;;  %v1137_v20 = vadd.f32 %v1136_v7, %v586_v63  ;;  %v905_v38 = vrot.slane %v904_v10, 4 }
  0xdb   : > { %v1008_v48 = vadd.f32 %v1007_v34, %v477_v25  ;;  %v1041_v5 = vadd.f32 %v1040_v54, %v505_v45  ;;  %v561_v17 = vld [vmem:[%s2572_s15 + $0x760] sm:$0xff]  ;;  %v1073_v19 = vadd.f32 %v1072_v6, %v532_v58  ;;  %v451_v21 = vld [vmem:[%s2572_s15 + $0x3f0] sm:$0xff]  ;;  %v534_v22 = vld [vmem:[%s2572_s15 + $0x688] sm:$0xff]  ;;  %v976_v30 = vadd.f32 %v975_v4, %v450_v1 }
  0xdc   : > { %v1106_v26 = vadd.f32 %v1105_v12, %v560_v3  ;;  %v588_v27 = vld [vmem:[%s2572_s15 + $0x838] sm:$0xff]  ;;  %v613_v28 = vld [vmem:[%s2572_s15 + $0x900] sm:$0xff]  ;;  %v562_v29 = vld [vmem:[%s2572_s15 + $0x768] sm:$0xff]  ;;  %v1138_v36 = vadd.f32 %v1137_v20, %v587_v13 }
  0xdd   : > { %v1009_v61 = vadd.f32 %v1008_v48, %v478_v39  ;;  %v1042_v18 = vadd.f32 %v1041_v5, %v506_v57  ;;  %v1074_v33 = vadd.f32 %v1073_v19, %v533_v9  ;;  %v614_v34 = vld [vmem:[%s2572_s15 + $0x908] sm:$0xff]  ;;  %v615_v35 = vld [vmem:[%s2572_s15 + $0x910] sm:$0xff]  ;;  %v509_v37 = vld [vmem:[%s2572_s15 + $0x5c0] sm:$0xff]  ;;  %v977_v58 = vadd.f32 %v976_v30, %v451_v21 }
  0xde   : > { %v535_v32 = vld [vmem:[%s2572_s15 + $0x690] sm:$0xff]  ;;  %v1107_v40 = vadd.f32 %v1106_v26, %v561_v17  ;;  %v589_v41 = vld [vmem:[%s2572_s15 + $0x840] sm:$0xff]  ;;  %v1170_v42 = vadd.f32 %v614_v34, %v613_v28  ;;  %v482_v43 = vld [vmem:[%s2572_s15 + $0x4e8] sm:$0xff]  ;;  %v1139_v48 = vadd.f32 %v1138_v36, %v588_v27 }
  0xdf   : > { %v1010_v11 = vadd.f32 %v1009_v61, %v479_v52  ;;  %v1043_v31 = vadd.f32 %v1042_v18, %v507_v8  ;;  %v563_v44 = vld [vmem:[%s2572_s15 + $0x770] sm:$0xff]  ;;  %v1075_v46 = vadd.f32 %v1074_v33, %v534_v22  ;;  %v616_v47 = vld [vmem:[%s2572_s15 + $0x918] sm:$0xff]  ;;  %v510_v49 = vld [vmem:[%s2572_s15 + $0x5c8] sm:$0xff]  ;;  %v941_v52 = vadd.f32 %v940_v24, %v420_v14 }
  0xe0   : > { %v536_v50 = vld [vmem:[%s2572_s15 + $0x698] sm:$0xff]  ;;  %v1108_v53 = vadd.f32 %v1107_v40, %v562_v29  ;;  %v590_v54 = vld [vmem:[%s2572_s15 + $0x848] sm:$0xff]  ;;  %v1171_v55 = vadd.f32 %v1170_v42, %v615_v35  ;;  %v617_v61 = vld [vmem:[%s2572_s15 + $0x920] sm:$0xff]  ;;  %v1140_v62 = vadd.f32 %v1139_v48, %v589_v41 }
  0xe1   : > { %v1011_v25 = vadd.f32 %v1010_v11, %v480_v2  ;;  %v1044_v45 = vadd.f32 %v1043_v31, %v508_v16  ;;  %v452_v56 = vld [vmem:[%s2572_s15 + $0x3f8] sm:$0xff]  ;;  %v1076_v60 = vadd.f32 %v1075_v46, %v535_v32  ;;  %v511_v63 = vld [vmem:[%s2572_s15 + $0x5d0] sm:$0xff]  ;;  %v537_v1 = vld [vmem:[%s2572_s15 + $0x6a0] sm:$0xff]  ;;  %v906_v2 = vadd.f32 %v905_v38, %v904_v10 }
  0xe2   : > { %v564_v57 = vld [vmem:[%s2572_s15 + $0x778] sm:$0xff]  ;;  %v1109_v4 = vadd.f32 %v1108_v53, %v563_v44  ;;  %v591_v5 = vld [vmem:[%s2572_s15 + $0x850] sm:$0xff]  ;;  %v1172_v6 = vadd.f32 %v1171_v55, %v616_v47  ;;  %v565_v8 = vld [vmem:[%s2572_s15 + $0x780] sm:$0xff]  ;;  %v1141_v13 = vadd.f32 %v1140_v62, %v590_v54  ;;  %v2926_v10 = vadd.f32 %v870_v51, %v869_v23 }
  0xe3   : > { %v1012_v39 = vadd.f32 %v1011_v25, %v481_v15  ;;  %v1045_v59 = vadd.f32 %v1044_v45, %v509_v37  ;;  %v483_v7 = vld [vmem:[%s2572_s15 + $0x4f0] sm:$0xff]  ;;  %v1077_v11 = vadd.f32 %v1076_v60, %v536_v50  ;;  %v618_v12 = vld [vmem:[%s2572_s15 + $0x928] sm:$0xff]  ;;  %v512_v14 = vld [vmem:[%s2572_s15 + $0x5d8] sm:$0xff]  ;;  %v942_v16 = vrot.slane %v941_v52, 4 }
  0xe4   : > { %v538_v15 = vld [vmem:[%s2572_s15 + $0x6a8] sm:$0xff]  ;;  %v1110_v17 = vadd.f32 %v1109_v4, %v564_v57  ;;  %v592_v18 = vld [vmem:[%s2572_s15 + $0x858] sm:$0xff]  ;;  %v1173_v19 = vadd.f32 %v1172_v6, %v617_v61  ;;  %v513_v21 = vld [vmem:[%s2572_s15 + $0x5e0] sm:$0xff]  ;;  %v978_v24 = vadd.f32 %v977_v58, %v452_v56  ;;  %v1142_v28 = vadd.f32 %v1141_v13, %v591_v5 }
  0xe5   : > { %v1013_v3 = vadd.f32 %v1012_v39, %v482_v43  ;;  %v1046_v9 = vadd.f32 %v1045_v59, %v510_v49  ;;  %v484_v20 = vld [vmem:[%s2572_s15 + $0x4f8] sm:$0xff]  ;;  %v566_v22 = vld [vmem:[%s2572_s15 + $0x788] sm:$0xff]  ;;  %v1078_v26 = vadd.f32 %v1077_v11, %v537_v1  ;;  %v619_v27 = vld [vmem:[%s2572_s15 + $0x930] sm:$0xff]  ;;  %v907_v31 = vrot.slane %v906_v2, 2 }
  0xe6   : > { %v514_v29 = vld [vmem:[%s2572_s15 + $0x5e8] sm:$0xff]  ;;  %v539_v30 = vld [vmem:[%s2572_s15 + $0x6b0] sm:$0xff]  ;;  %v1111_v34 = vadd.f32 %v1110_v17, %v565_v8  ;;  %v1174_v35 = vadd.f32 %v1173_v19, %v618_v12  ;;  %v620_v32 = vld [vmem:[%s2572_s15 + $0x938] sm:$0xff]  ;;  %v1143_v40 = vadd.f32 %v1142_v28, %v592_v18  ;;  %v872_v42 = vrot.slane %v2926_v10, 1 }
  0xe7   : > { %v1047_v25 = vadd.f32 %v1046_v9, %v511_v63  ;;  %v567_v23 = vld [vmem:[%s2572_s15 + $0x790] sm:$0xff]  ;;  %v1014_v33 = vadd.f32 %v1013_v3, %v483_v7  ;;  %v1079_v37 = vadd.f32 %v1078_v26, %v538_v15  ;;  %v645_v38 = vld [vmem:[%s2572_s15 + $0xa00] sm:$0xff]  ;;  %v646_v39 = vld [vmem:[%s2572_s15 + $0xa08] sm:$0xff]  ;;  %v943_v43 = vadd.f32 %v942_v16, %v941_v52 }
  0xe8   : > { %v540_v41 = vld [vmem:[%s2572_s15 + $0x6b8] sm:$0xff]  ;;  %v1112_v44 = vadd.f32 %v1111_v34, %v566_v22  ;;  %v593_v45 = vld [vmem:[%s2572_s15 + $0x860] sm:$0xff]  ;;  %v647_v46 = vld [vmem:[%s2572_s15 + $0xa10] sm:$0xff]  ;;  %v1175_v47 = vadd.f32 %v1174_v35, %v619_v27  ;;  %v979_v49 = vrot.slane %v978_v24, 4  ;;  %v1207_v54 = vadd.f32 %v646_v39, %v645_v38 }
  0xe9   : > { %v1048_v36 = vadd.f32 %v1047_v25, %v512_v14  ;;  %v568_v48 = vld [vmem:[%s2572_s15 + $0x798] sm:$0xff]  ;;  %v1080_v51 = vadd.f32 %v1079_v37, %v539_v30  ;;  %v621_v53 = vld [vmem:[%s2572_s15 + $0x940] sm:$0xff]  ;;  %v515_v55 = vld [vmem:[%s2572_s15 + $0x5f0] sm:$0xff]  ;;  %v2947_v57 = vadd.f32 %v907_v31, %v906_v2  ;;  %v1015_v52 = vadd.f32 %v1014_v33, %v484_v20 }
  0xea   : > { %v541_v56 = vld [vmem:[%s2572_s15 + $0x6c0] sm:$0xff]  ;;  %v1113_v58 = vadd.f32 %v1112_v44, %v567_v23  ;;  %v648_v59 = vld [vmem:[%s2572_s15 + $0xa18] sm:$0xff]  ;;  %v1176_v60 = vadd.f32 %v1175_v47, %v620_v32  ;;  %v622_v3 = vld [vmem:[%s2572_s15 + $0x948] sm:$0xff]  ;;  %v1144_v4 = vadd.f32 %v1143_v40, %v593_v45  ;;  %v1208_v5 = vadd.f32 %v1207_v54, %v647_v46 }
  0xeb   : > { %v1049_v50 = vadd.f32 %v1048_v36, %v513_v21  ;;  %v516_v61 = vld [vmem:[%s2572_s15 + $0x5f8] sm:$0xff]  ;;  %v569_v62 = vld [vmem:[%s2572_s15 + $0x7a0] sm:$0xff]  ;;  %v1081_v1 = vadd.f32 %v1080_v51, %v540_v41  ;;  %v542_v6 = vld [vmem:[%s2572_s15 + $0x6c8] sm:$0xff]  ;;  %v944_v7 = vrot.slane %v943_v43, 2  ;;  %v980_v13 = vadd.f32 %v979_v49, %v978_v24 }
  0xec   : > { %v1114_v8 = vadd.f32 %v1113_v58, %v568_v48  ;;  %v594_v2 = vld [vmem:[%s2572_s15 + $0x868] sm:$0xff]  ;;  %v649_v9 = vld [vmem:[%s2572_s15 + $0xa20] sm:$0xff]  ;;  %v1177_v11 = vadd.f32 %v1176_v60, %v621_v53  ;;  %v623_v16 = vld [vmem:[%s2572_s15 + $0x950] sm:$0xff]  ;;  %v1209_v17 = vadd.f32 %v1208_v5, %v648_v59  ;;  %v2336_v18 = vmov 0.0|0.0  }
  0xed   : > { %v1050_v63 = vadd.f32 %v1049_v50, %v514_v29  ;;  %v570_v12 = vld [vmem:[%s2572_s15 + $0x7a8] sm:$0xff]  ;;  %v1082_v15 = vadd.f32 %v1081_v1, %v541_v56  ;;  %1975 = vmatprep.subr.bf16.mxu1 %v2336_v18  ;;  %v543_v19 = vld [vmem:[%s2572_s15 + $0x6d0] sm:$0xff]  ;;  %v873_v20 = vadd.f32 %v872_v42, %v2926_v10  ;;  %v1016_v21 = vrot.slane %v1015_v52, 4  ;;  %v624_v29 = vld [vmem:[%s2572_s15 + $0x958] sm:$0xff] }
  0xee   : > { %v1115_v22 = vadd.f32 %v1114_v8, %v569_v62  ;;  %v650_v25 = vld [vmem:[%s2572_s15 + $0xa28] sm:$0xff]  ;;  %v1178_v24 = vadd.f32 %v1177_v11, %v622_v3  ;;  %v571_v26 = vld [vmem:[%s2572_s15 + $0x7b0] sm:$0xff]  ;;  %v1145_v30 = vadd.f32 %v1144_v4, %v594_v2  ;;  %v1210_v23 = vadd.f32 %v1209_v17, %v649_v9  ;;  %v544_v31 = vld [vmem:[%s2572_s15 + $0x6d8] sm:$0xff] }
  0xef   : > { %v1051_v14 = vadd.f32 %v1050_v63, %v515_v55  ;;  %v1083_v28 = vadd.f32 %v1082_v15, %v542_v6  ;;  %v909_v33 = vrot.slane %v2947_v57, 1  ;;  %v595_v10 = vld [vmem:[%s2572_s15 + $0x870] sm:$0xff]  ;;  %v545_v37 = vld [vmem:[%s2572_s15 + $0x6e0] sm:$0xff]  ;;  %v572_v32 = vld [vmem:[%s2572_s15 + $0x7b8] sm:$0xff]  ;;  %v945_v38 = vadd.f32 %v944_v7, %v943_v43 }
  0xf0   : > { %v1116_v34 = vadd.f32 %v1115_v22, %v570_v12  ;;  %v651_v35 = vld [vmem:[%s2572_s15 + $0xa30] sm:$0xff]  ;;  %v1179_v36 = vadd.f32 %v1178_v24, %v623_v16  ;;  %v981_v39 = vrot.slane %v980_v13, 2  ;;  %v625_v41 = vld [vmem:[%s2572_s15 + $0x960] sm:$0xff]  ;;  %v1211_v42 = vadd.f32 %v1210_v23, %v650_v25  ;;  %v652_v47 = vld [vmem:[%s2572_s15 + $0xa38] sm:$0xff] }
  0xf1   : > { %v1052_v27 = vadd.f32 %v1051_v14, %v516_v61  ;;  %v1084_v40 = vadd.f32 %v1083_v28, %v543_v19  ;;  %v2971_v46 = vmul.f32 0.00390625, %v873_v20  ;;  %v677_v48 = vld [vmem:[%s2572_s15 + $0xb00] sm:$0xff]  ;;  %v678_v49 = vld [vmem:[%s2572_s15 + $0xb08] sm:$0xff]  ;;  %v1017_v51 = vadd.f32 %v1016_v21, %v1015_v52  ;;  %v679_v55 = vld [vmem:[%s2572_s15 + $0xb10] sm:$0xff] }
  0xf2   : > { %v1117_v45 = vadd.f32 %v1116_v34, %v571_v26  ;;  %v1180_v50 = vadd.f32 %v1179_v36, %v624_v29  ;;  %v573_v43 = vld [vmem:[%s2572_s15 + $0x7c0] sm:$0xff]  ;;  %v626_v54 = vld [vmem:[%s2572_s15 + $0x968] sm:$0xff]  ;;  %v1146_v56 = vadd.f32 %v1145_v30, %v595_v10  ;;  %v1212_v58 = vadd.f32 %v1211_v42, %v651_v35  ;;  %v596_v62 = vld [vmem:[%s2572_s15 + $0x878] sm:$0xff] }
  0xf3   : > { %v1053_v44 = vrot.slane %v1052_v27, 4  ;;  %v1085_v53 = vadd.f32 %v1084_v40, %v544_v31  ;;  %v546_v59 = vld [vmem:[%s2572_s15 + $0x6e8] sm:$0xff]  ;;  %v910_v60 = vadd.f32 %v909_v33, %v2947_v57  ;;  %v653_v63 = vld [vmem:[%s2572_s15 + $0xa40] sm:$0xff]  ;;  %v1244_v3 = vadd.f32 %v678_v49, %v677_v48  ;;  %v627_v7 = vld [vmem:[%s2572_s15 + $0x970] sm:$0xff] }
  0xf4   : > { %v1118_v61 = vadd.f32 %v1117_v45, %v572_v32  ;;  %v1181_v1 = vadd.f32 %v1180_v50, %v625_v41  ;;  %v574_v4 = vld [vmem:[%s2572_s15 + $0x7c8] sm:$0xff]  ;;  %v946_v52 = vrot.slane %v945_v38, 1  ;;  %v982_v5 = vadd.f32 %v981_v39, %v980_v13  ;;  %v680_v8 = vld [vmem:[%s2572_s15 + $0xb18] sm:$0xff]  ;;  %v547_v9 = vld [vmem:[%s2572_s15 + $0x6f0] sm:$0xff] }
  0xf5   : > { %v1086_v6 = vadd.f32 %v1085_v53, %v545_v37  ;;  %v1213_v2 = vadd.f32 %v1212_v58, %v652_v47  ;;  %v1054_v11 = vadd.f32 %v1053_v44, %v1052_v27  ;;  %v654_v12 = vld [vmem:[%s2572_s15 + $0xa48] sm:$0xff]  ;;  %v1245_v15 = vadd.f32 %v1244_v3, %v679_v55  ;;  %v575_v16 = vld [vmem:[%s2572_s15 + $0x7d0] sm:$0xff]  ;;  %v628_v13 = vld [vmem:[%s2572_s15 + $0x978] sm:$0xff] }
  0xf6   : > { %v1119_v57 = vadd.f32 %v1118_v61, %v573_v43  ;;  %v1182_v14 = vadd.f32 %v1181_v1, %v626_v54  ;;  %v1018_v17 = vrot.slane %v1017_v51, 2  ;;  %v681_v20 = vld [vmem:[%s2572_s15 + $0xb20] sm:$0xff]  ;;  %v1147_v21 = vadd.f32 %v1146_v56, %v596_v62  ;;  %v548_v25 = vld [vmem:[%s2572_s15 + $0x6f8] sm:$0xff]  ;;  %v655_v28 = vld [vmem:[%s2572_s15 + $0xa50] sm:$0xff] }
  0xf7   : > { %v1087_v19 = vadd.f32 %v1086_v6, %v546_v59  ;;  %v1214_v22 = vadd.f32 %v1213_v2, %v653_v63  ;;  %v1430_v26 = vmul.f32 0.00390625, %v910_v60  ;;  %v597_v27 = vld [vmem:[%s2572_s15 + $0x880] sm:$0xff]  ;;  %v1246_v30 = vadd.f32 %v1245_v15, %v680_v8  ;;  %v576_v23 = vld [vmem:[%s2572_s15 + $0x7d8] sm:$0xff]  ;;  %v682_v35 = vld [vmem:[%s2572_s15 + $0xb28] sm:$0xff] }
  0xf8   : > { %v1120_v24 = vadd.f32 %v1119_v57, %v574_v4  ;;  %v1183_v29 = vadd.f32 %v1182_v14, %v627_v7  ;;  %v947_v31 = vadd.f32 %v946_v52, %v945_v38  ;;  %v983_v33 = vrot.slane %v982_v5, 1  ;;  %v629_v10 = vld [vmem:[%s2572_s15 + $0x980] sm:$0xff]  ;;  %v656_v40 = vld [vmem:[%s2572_s15 + $0xa58] sm:$0xff]  ;;  %v578_v44 = vld [vmem:[%s2572_s15 + $0x7e8] sm:$0xff] }
  0xf9   : > { %v1088_v34 = vadd.f32 %v1087_v19, %v547_v9  ;;  %v1215_v36 = vadd.f32 %v1214_v22, %v654_v12  ;;  %v577_v37 = vld [vmem:[%s2572_s15 + $0x7e0] sm:$0xff]  ;;  %v1055_v32 = vrot.slane %v1054_v11, 2  ;;  %v1247_v42 = vadd.f32 %v1246_v30, %v681_v20  ;;  %v598_v38 = vld [vmem:[%s2572_s15 + $0x888] sm:$0xff]  ;;  %v683_v48 = vld [vmem:[%s2572_s15 + $0xb30] sm:$0xff] }
  0xfa   : > { %v1121_v39 = vadd.f32 %v1120_v24, %v575_v16  ;;  %v1184_v41 = vadd.f32 %v1183_v29, %v628_v13  ;;  %v1019_v45 = vadd.f32 %v1018_v17, %v1017_v51  ;;  %v1148_v49 = vadd.f32 %v1147_v21, %v597_v27  ;;  %v630_v54 = vld [vmem:[%s2572_s15 + $0x988] sm:$0xff]  ;;  %v657_v55 = vld [vmem:[%s2572_s15 + $0xa60] sm:$0xff]  ;;  %v684_v62 = vld [vmem:[%s2572_s15 + $0xb38] sm:$0xff] }
  0xfb   : > { %v1089_v47 = vadd.f32 %v1088_v34, %v548_v25  ;;  %v1216_v50 = vadd.f32 %v1215_v36, %v655_v28  ;;  %v1462_v53 = vsel %vm1461_vm0, %v1430_v26, %v2971_v46  ;;  %v709_v56 = vld [vmem:[%s2572_s15 + $0xc00] sm:$0xff]  ;;  %v1248_v51 = vadd.f32 %v1247_v42, %v682_v35  ;;  %v710_v63 = vld [vmem:[%s2572_s15 + $0xc08] sm:$0xff]  ;;  %v711_v1 = vld [vmem:[%s2572_s15 + $0xc10] sm:$0xff] }
  0xfc   : > { %v1122_v43 = vadd.f32 %v1121_v39, %v576_v23  ;;  %v1185_v58 = vadd.f32 %v1184_v41, %v629_v10  ;;  %v984_v59 = vadd.f32 %v983_v33, %v982_v5  ;;  %v1431_v61 = vmul.f32 0.00390625, %v947_v31  ;;  %v658_v52 = vld [vmem:[%s2572_s15 + $0xa68] sm:$0xff]  ;;  %v579_v8 = vld [vmem:[%s2572_s15 + $0x7f0] sm:$0xff]  ;;  %v685_v5 = vld [vmem:[%s2572_s15 + $0xb40] sm:$0xff] }
  0xfd   : > { %v1090_v60 = vrot.slane %v1089_v47, 4  ;;  %v1217_v3 = vadd.f32 %v1216_v50, %v656_v40  ;;  %v1056_v46 = vadd.f32 %v1055_v32, %v1054_v11  ;;  %v1249_v6 = vadd.f32 %v1248_v51, %v683_v48  ;;  %v712_v57 = vld [vmem:[%s2572_s15 + $0xc18] sm:$0xff]  ;;  %v599_v17 = vld [vmem:[%s2572_s15 + $0x890] sm:$0xff]  ;;  %v686_v26 = vld [vmem:[%s2572_s15 + $0xb48] sm:$0xff] }
  0xfe   : > { %v1123_v4 = vadd.f32 %v1122_v43, %v577_v37  ;;  %v1281_v7 = vadd.f32 %v710_v63, %v709_v56  ;;  %v1020_v2 = vrot.slane %v1019_v45, 1  ;;  %v1149_v12 = vadd.f32 %v1148_v49, %v598_v38  ;;  %v580_v15 = vld [vmem:[%s2572_s15 + $0x7f8] sm:$0xff]  ;;  %v659_v19 = vld [vmem:[%s2572_s15 + $0xa70] sm:$0xff]  ;;  %v713_v27 = vld [vmem:[%s2572_s15 + $0xc20] sm:$0xff] }
  0xff   : > { %v1091_v9 = vadd.f32 %v1090_v60, %v1089_v47  ;;  %v1218_v14 = vadd.f32 %v1217_v3, %v657_v55  ;;  %v1186_v11 = vadd.f32 %v1185_v58, %v630_v54  ;;  %v1250_v13 = vadd.f32 %v1249_v6, %v684_v62  ;;  %v631_v24 = vld [vmem:[%s2572_s15 + $0x990] sm:$0xff]  ;;  %v660_v23 = vld [vmem:[%s2572_s15 + $0xa78] sm:$0xff]  ;;  %v714_v36 = vld [vmem:[%s2572_s15 + $0xc28] sm:$0xff] }
 0x100   : > { %v1124_v16 = vadd.f32 %v1123_v4, %v578_v44  ;;  %v1282_v20 = vadd.f32 %v1281_v7, %v711_v1  ;;  %v1432_v22 = vmul.f32 0.00390625, %v984_v59  ;;  %v1464_v25 = vsel %vm1463_vm1, %v1431_v61, %v1462_v53  ;;  %v687_v35 = vld [vmem:[%s2572_s15 + $0xb50] sm:$0xff]  ;;  %v600_v40 = vld [vmem:[%s2572_s15 + $0x898] sm:$0xff]  ;;  %v661_v41 = vld [vmem:[%s2572_s15 + $0xa80] sm:$0xff] }
 0x101   : > { %v1092_v21 = vrot.slane %v1091_v9, 2  ;;  %v1219_v28 = vadd.f32 %v1218_v14, %v658_v52  ;;  %v1057_v29 = vrot.slane %v1056_v46, 1  ;;  %v1251_v31 = vadd.f32 %v1250_v13, %v685_v5  ;;  %v688_v48 = vld [vmem:[%s2572_s15 + $0xb58] sm:$0xff]  ;;  %v715_v49 = vld [vmem:[%s2572_s15 + $0xc30] sm:$0xff]  ;;  %v662_v54 = vld [vmem:[%s2572_s15 + $0xa88] sm:$0xff] }
 0x102   : > { %v1125_v30 = vadd.f32 %v1124_v16, %v579_v8  ;;  %v1283_v33 = vadd.f32 %v1282_v20, %v712_v57  ;;  %v1021_v34 = vadd.f32 %v1020_v2, %v1019_v45  ;;  %v1150_v37 = vadd.f32 %v1149_v12, %v599_v17  ;;  %v632_v45 = vld [vmem:[%s2572_s15 + $0x998] sm:$0xff]  ;;  %v689_v55 = vld [vmem:[%s2572_s15 + $0xb60] sm:$0xff]  ;;  %v742_v62 = vld [vmem:[%s2572_s15 + $0xd08] sm:$0xff] }
 0x103   : > { %v1093_v10 = vadd.f32 %v1092_v21, %v1091_v9  ;;  %v1220_v32 = vadd.f32 %v1219_v28, %v659_v19  ;;  %v1187_v42 = vadd.f32 %v1186_v11, %v631_v24  ;;  %v1252_v44 = vadd.f32 %v1251_v31, %v686_v26  ;;  %v716_v60 = vld [vmem:[%s2572_s15 + $0xc38] sm:$0xff]  ;;  %v741_v61 = vld [vmem:[%s2572_s15 + $0xd00] sm:$0xff]  ;;  %v663_v4 = vld [vmem:[%s2572_s15 + $0xa90] sm:$0xff] }
 0x104   : > { %v1126_v39 = vadd.f32 %v1125_v30, %v580_v15  ;;  %v1284_v47 = vadd.f32 %v1283_v33, %v713_v27  ;;  %v1058_v43 = vadd.f32 %v1057_v29, %v1056_v46  ;;  %v1433_v51 = vmul.f32 0.00390625, %v1021_v34  ;;  %v601_v46 = vld [vmem:[%s2572_s15 + $0x8a0] sm:$0xff]  ;;  %v743_v52 = vld [vmem:[%s2572_s15 + $0xd10] sm:$0xff]  ;;  %v690_v5 = vld [vmem:[%s2572_s15 + $0xb68] sm:$0xff] }
 0x105   : > { %v1094_v38 = vrot.slane %v1093_v10, 1  ;;  %v1221_v50 = vadd.f32 %v1220_v32, %v660_v23  ;;  %v1253_v56 = vadd.f32 %v1252_v44, %v687_v35  ;;  %v1466_v59 = vsel %vm1465_vm2, %v1432_v22, %v1464_v25  ;;  %v633_v9 = vld [vmem:[%s2572_s15 + $0x9a0] sm:$0xff]  ;;  %v664_v17 = vld [vmem:[%s2572_s15 + $0xa98] sm:$0xff]  ;;  %v691_v21 = vld [vmem:[%s2572_s15 + $0xb70] sm:$0xff] }
 0x106   : > { %v1127_v53 = vrot.slane %v1126_v39, 4  ;;  %v1285_v58 = vadd.f32 %v1284_v47, %v714_v36  ;;  %v1151_v63 = vadd.f32 %v1150_v37, %v600_v40  ;;  %v1188_v6 = vadd.f32 %v1187_v42, %v632_v45  ;;  %v717_v57 = vld [vmem:[%s2572_s15 + $0xc40] sm:$0xff]  ;;  %v744_v19 = vld [vmem:[%s2572_s15 + $0xd18] sm:$0xff]  ;;  %v718_v22 = vld [vmem:[%s2572_s15 + $0xc48] sm:$0xff] }
 0x107   : > { %v1222_v1 = vadd.f32 %v1221_v50, %v661_v41  ;;  %v1254_v7 = vadd.f32 %v1253_v56, %v688_v48  ;;  %v1095_v2 = vadd.f32 %v1094_v38, %v1093_v10  ;;  %v1318_v14 = vadd.f32 %v742_v62, %v741_v61  ;;  %v602_v28 = vld [vmem:[%s2572_s15 + $0x8a8] sm:$0xff]  ;;  %v665_v29 = vld [vmem:[%s2572_s15 + $0xaa0] sm:$0xff]  ;;  %v692_v35 = vld [vmem:[%s2572_s15 + $0xb78] sm:$0xff] }
 0x108   : > { %v1128_v3 = vadd.f32 %v1127_v53, %v1126_v39  ;;  %v1286_v8 = vadd.f32 %v1285_v58, %v715_v49  ;;  %v1434_v16 = vmul.f32 0.00390625, %v1058_v43  ;;  %v1468_v20 = vsel %vm1467_vm3, %v1433_v51, %v1466_v59  ;;  %v745_v30 = vld [vmem:[%s2572_s15 + $0xd20] sm:$0xff]  ;;  %v634_v10 = vld [vmem:[%s2572_s15 + $0x9a8] sm:$0xff]  ;;  %v719_v36 = vld [vmem:[%s2572_s15 + $0xc50] sm:$0xff] }
 0x109   : > { %v1223_v12 = vadd.f32 %v1222_v1, %v662_v54  ;;  %v1255_v11 = vadd.f32 %v1254_v7, %v689_v55  ;;  %v1152_v25 = vadd.f32 %v1151_v63, %v601_v46  ;;  %v1319_v26 = vadd.f32 %v1318_v14, %v743_v52  ;;  %v746_v41 = vld [vmem:[%s2572_s15 + $0xd28] sm:$0xff]  ;;  %v603_v47 = vld [vmem:[%s2572_s15 + $0x8b0] sm:$0xff]  ;;  %v693_v38 = vld [vmem:[%s2572_s15 + $0xb80] sm:$0xff] }
 0x10a   : > { %v1129_v15 = vrot.slane %v1128_v3, 2  ;;  %v1287_v13 = vadd.f32 %v1286_v8, %v716_v60  ;;  %v1189_v23 = vadd.f32 %v1188_v6, %v633_v9  ;;  %v1435_v34 = vmul.f32 0.00390625, %v1095_v2  ;;  %v720_v45 = vld [vmem:[%s2572_s15 + $0xc58] sm:$0xff]  ;;  %v635_v53 = vld [vmem:[%s2572_s15 + $0x9b0] sm:$0xff]  ;;  %v666_v54 = vld [vmem:[%s2572_s15 + $0xaa8] sm:$0xff] }
 0x10b   : > { %v1224_v24 = vadd.f32 %v1223_v12, %v663_v4  ;;  %v1256_v31 = vadd.f32 %v1255_v11, %v690_v5  ;;  %v1320_v32 = vadd.f32 %v1319_v26, %v744_v19  ;;  %v1470_v40 = vsel %vm1469_vm4, %v1434_v16, %v1468_v20  ;;  %v747_v55 = vld [vmem:[%s2572_s15 + $0xd30] sm:$0xff]  ;;  %v694_v60 = vld [vmem:[%s2572_s15 + $0xb88] sm:$0xff]  ;;  %v721_v61 = vld [vmem:[%s2572_s15 + $0xc60] sm:$0xff] }
 0x10c   : > { %v1130_v27 = vadd.f32 %v1129_v15, %v1128_v3  ;;  %v1288_v33 = vadd.f32 %v1287_v13, %v717_v57  ;;  %v1153_v48 = vadd.f32 %v1152_v25, %v602_v28  ;;  %v1190_v56 = vadd.f32 %v1189_v23, %v634_v10  ;;  %v748_v62 = vld [vmem:[%s2572_s15 + $0xd38] sm:$0xff]  ;;  %v773_v3 = vld [vmem:[%s2572_s15 + $0xe00] sm:$0xff]  ;;  %v774_v46 = vld [vmem:[%s2572_s15 + $0xe08] sm:$0xff] }
 0x10d   : > { %v1225_v37 = vadd.f32 %v1224_v24, %v664_v17  ;;  %v1257_v42 = vadd.f32 %v1256_v31, %v691_v21  ;;  %v1321_v50 = vadd.f32 %v1320_v32, %v745_v30  ;;  %v1472_v59 = vsel %vm1471_vm5, %v1435_v34, %v1470_v40  ;;  %v775_v4 = vld [vmem:[%s2572_s15 + $0xe10] sm:$0xff]  ;;  %v604_v7 = vld [vmem:[%s2572_s15 + $0x8b8] sm:$0xff]  ;;  %v722_v2 = vld [vmem:[%s2572_s15 + $0xc68] sm:$0xff] }
 0x10e   : > { %v1131_v39 = vrot.slane %v1130_v27, 1  ;;  %v1289_v44 = vadd.f32 %v1288_v33, %v718_v22  ;;  %v695_v8 = vld [vmem:[%s2572_s15 + $0xb90] sm:$0xff]  ;;  %v1154_v9 = vadd.f32 %v1153_v48, %v603_v47  ;;  %v1355_v12 = vadd.f32 %v774_v46, %v773_v3  ;;  %v749_v16 = vld [vmem:[%s2572_s15 + $0xd40] sm:$0xff]  ;;  %v776_v17 = vld [vmem:[%s2572_s15 + $0xe18] sm:$0xff] }
 0x10f   : > { %v1226_v49 = vadd.f32 %v1225_v37, %v665_v29  ;;  %v1258_v58 = vadd.f32 %v1257_v42, %v692_v35  ;;  %v1322_v63 = vadd.f32 %v1321_v50, %v746_v41  ;;  %v667_v15 = vld [vmem:[%s2572_s15 + $0xab0] sm:$0xff]  ;;  %v1191_v19 = vadd.f32 %v1190_v56, %v635_v53  ;;  %v636_v20 = vld [vmem:[%s2572_s15 + $0x9b8] sm:$0xff]  ;;  %v750_v26 = vld [vmem:[%s2572_s15 + $0xd48] sm:$0xff] }
 0x110   : > { %v1132_v43 = vadd.f32 %v1131_v39, %v1130_v27  ;;  %v1290_v51 = vadd.f32 %v1289_v44, %v719_v36  ;;  %v696_v21 = vld [vmem:[%s2572_s15 + $0xb98] sm:$0xff]  ;;  %v723_v22 = vld [vmem:[%s2572_s15 + $0xc70] sm:$0xff]  ;;  %v1356_v24 = vadd.f32 %v1355_v12, %v775_v4  ;;  %v777_v27 = vld [vmem:[%s2572_s15 + $0xe20] sm:$0xff]  ;;  %v1155_v33 = vadd.f32 %v1154_v9, %v604_v7 }
 0x111   : > { %v1259_v52 = vadd.f32 %v1258_v58, %v693_v38  ;;  %v1227_v5 = vadd.f32 %v1226_v49, %v666_v54  ;;  %v1323_v57 = vadd.f32 %v1322_v63, %v747_v55  ;;  %v605_v30 = vld [vmem:[%s2572_s15 + $0x8c0] sm:$0xff]  ;;  %v724_v31 = vld [vmem:[%s2572_s15 + $0xc78] sm:$0xff]  ;;  %v778_v37 = vld [vmem:[%s2572_s15 + $0xe28] sm:$0xff]  ;;  %v1192_v32 = vadd.f32 %v1191_v19, %v636_v20 }
 0x112   : > { %v1436_v1 = vmul.f32 0.00390625, %v1132_v43  ;;  %v1291_v6 = vadd.f32 %v1290_v51, %v720_v45  ;;  %v697_v23 = vld [vmem:[%s2572_s15 + $0xba0] sm:$0xff]  ;;  %v1357_v35 = vadd.f32 %v1356_v24, %v776_v17  ;;  %v668_v36 = vld [vmem:[%s2572_s15 + $0xab8] sm:$0xff]  ;;  %v698_v42 = vld [vmem:[%s2572_s15 + $0xba8] sm:$0xff]  ;;  %v1156_v51 = vadd.f32 %v1155_v33, %v605_v30 }
 0x113   : > { %v1260_v11 = vadd.f32 %v1259_v52, %v694_v60  ;;  %v1324_v25 = vadd.f32 %v1323_v57, %v748_v62  ;;  %v1228_v34 = vadd.f32 %v1227_v5, %v667_v15  ;;  %v637_v41 = vld [vmem:[%s2572_s15 + $0x9c0] sm:$0xff]  ;;  %v606_v45 = vld [vmem:[%s2572_s15 + $0x8c8] sm:$0xff]  ;;  %v752_v49 = vld [vmem:[%s2572_s15 + $0xd58] sm:$0xff] }
 0x114   : > { %v1474_v14 = vsel %vm1473_vm6, %v1436_v1, %v1472_v59  ;;  %v1292_v13 = vadd.f32 %v1291_v6, %v721_v61  ;;  %v725_v44 = vld [vmem:[%s2572_s15 + $0xc80] sm:$0xff]  ;;  %v1358_v38 = vadd.f32 %v1357_v35, %v777_v27  ;;  %v779_v50 = vld [vmem:[%s2572_s15 + $0xe30] sm:$0xff]  ;;  %v638_v54 = vld [vmem:[%s2572_s15 + $0x9c8] sm:$0xff]  ;;  %v1193_v3 = vadd.f32 %v1192_v32, %v637_v41 }
 0x115   : > { %1484 = vst [vmem:[%s3077_s29] sm:$0xff] %v1474_v14  ;;  %1595 = vmatmul.mubr.f32.vlgmr.msra.gmra.mrb[0].mxu0 %v1474_v14  ;;  %v1261_v28 = vadd.f32 %v1260_v11, %v695_v8  ;;  %v1325_v10 = vadd.f32 %v1324_v25, %v749_v16  ;;  %v669_v48 = vld [vmem:[%s2572_s15 + $0xac0] sm:$0xff]  ;;  %v699_v55 = vld [vmem:[%s2572_s15 + $0xbb0] sm:$0xff]  ;;  %v700_v56 = vld [vmem:[%s2572_s15 + $0xbb8] sm:$0xff]  ;;  %v1229_v59 = vadd.f32 %v1228_v34, %v668_v36 }
 0x116   : > { %1600 = vmatprep.mubr.f32.mxu0 %v2335_v0  ;;  %v1293_v29 = vadd.f32 %v1292_v13, %v722_v2  ;;  %v751_v0 = vld [vmem:[%s2572_s15 + $0xd50] sm:$0xff]  ;;  %v726_v58 = vld [vmem:[%s2572_s15 + $0xc88] sm:$0xff]  ;;  %v1359_v61 = vadd.f32 %v1358_v38, %v778_v37  ;;  %v753_v62 = vld [vmem:[%s2572_s15 + $0xd60] sm:$0xff]  ;;  %v1157_v11 = vadd.f32 %v1156_v51, %v606_v45 }
 0x117   : > { %v1262_v39 = vadd.f32 %v1261_v28, %v696_v21  ;;  %v1326_v47 = vadd.f32 %v1325_v10, %v750_v26  ;;  %v780_v63 = vld [vmem:[%s2572_s15 + $0xe38] sm:$0xff]  ;;  %v805_v1 = vld [vmem:[%s2572_s15 + $0xf00] sm:$0xff]  ;;  %v727_v52 = vld [vmem:[%s2572_s15 + $0xc90] sm:$0xff]  ;;  %v1230_v13 = vadd.f32 %v1229_v59, %v669_v48  ;;  %v1194_v26 = vadd.f32 %v1193_v3, %v638_v54 }
 0x118   : > { %v1294_v40 = vadd.f32 %v1293_v29, %v723_v22  ;;  %v806_v6 = vld [vmem:[%s2572_s15 + $0xf08] sm:$0xff]  ;;  %v807_v7 = vld [vmem:[%s2572_s15 + $0xf10] sm:$0xff]  ;;  %v1360_v2 = vadd.f32 %v1359_v61, %v779_v50  ;;  %v781_v5 = vld [vmem:[%s2572_s15 + $0xe40] sm:$0xff] }
 0x119   : > { %v1263_v43 = vadd.f32 %v1262_v39, %v697_v23  ;;  %v1327_v60 = vadd.f32 %v1326_v47, %v751_v0  ;;  %v754_v9 = vld [vmem:[%s2572_s15 + $0xd68] sm:$0xff]  ;;  %v1392_v14 = vadd.f32 %v806_v6, %v805_v1  ;;  %v607_v15 = vld [vmem:[%s2572_s15 + $0x8d0] sm:$0xff]  ;;  %v701_v16 = vld [vmem:[%s2572_s15 + $0xbc0] sm:$0xff] }
 0x11a   : > { %v1295_v53 = vadd.f32 %v1294_v40, %v724_v31  ;;  %v728_v17 = vld [vmem:[%s2572_s15 + $0xc98] sm:$0xff]  ;;  %v1361_v21 = vadd.f32 %v1360_v2, %v780_v63  ;;  %v670_v22 = vld [vmem:[%s2572_s15 + $0xac8] sm:$0xff]  ;;  %v755_v25 = vld [vmem:[%s2572_s15 + $0xd70] sm:$0xff]  ;;  %v1158_v50 = vadd.f32 %v1157_v11, %v607_v15 }
 0x11b   : > { %v1264_v46 = vadd.f32 %v1263_v43, %v698_v42  ;;  %v1328_v8 = vadd.f32 %v1327_v60, %v752_v49  ;;  %v808_v19 = vld [vmem:[%s2572_s15 + $0xf18] sm:$0xff]  ;;  %v782_v24 = vld [vmem:[%s2572_s15 + $0xe48] sm:$0xff]  ;;  %v1393_v29 = vadd.f32 %v1392_v14, %v807_v7  ;;  %v639_v30 = vld [vmem:[%s2572_s15 + $0x9d0] sm:$0xff] }
 0x11c   : > { %v1296_v4 = vadd.f32 %v1295_v53, %v725_v44  ;;  %v729_v23 = vld [vmem:[%s2572_s15 + $0xca0] sm:$0xff]  ;;  %v1362_v34 = vadd.f32 %v1361_v21, %v781_v5  ;;  %v756_v10 = vld [vmem:[%s2572_s15 + $0xd78] sm:$0xff]  ;;  %v783_v35 = vld [vmem:[%s2572_s15 + $0xe50] sm:$0xff]  ;;  %v1231_v44 = vadd.f32 %v1230_v13, %v670_v22  ;;  %v1195_v43 = vadd.f32 %v1194_v26, %v639_v30 }
 0x11d   : > { %v1265_v57 = vadd.f32 %v1264_v46, %v699_v55  ;;  %v1329_v20 = vadd.f32 %v1328_v8, %v753_v62  ;;  %v809_v31 = vld [vmem:[%s2572_s15 + $0xf20] sm:$0xff]  ;;  %v1394_v37 = vadd.f32 %v1393_v29, %v808_v19  ;;  %v608_v32 = vld [vmem:[%s2572_s15 + $0x8d8] sm:$0xff]  ;;  %v702_v40 = vld [vmem:[%s2572_s15 + $0xbc8] sm:$0xff] }
 0x11e   : > { %v1297_v12 = vadd.f32 %v1296_v4, %v726_v58  ;;  %v640_v39 = vld [vmem:[%s2572_s15 + $0x9d8] sm:$0xff]  ;;  %v730_v41 = vld [vmem:[%s2572_s15 + $0xca8] sm:$0xff]  ;;  %v1363_v38 = vadd.f32 %v1362_v34, %v782_v24  ;;  %v671_v45 = vld [vmem:[%s2572_s15 + $0xad0] sm:$0xff] }
 0x11f   : > { %v1266_v27 = vadd.f32 %v1265_v57, %v700_v56  ;;  %v1330_v33 = vadd.f32 %v1329_v20, %v754_v9  ;;  %v810_v42 = vld [vmem:[%s2572_s15 + $0xf28] sm:$0xff]  ;;  %v757_v48 = vld [vmem:[%s2572_s15 + $0xd80] sm:$0xff]  ;;  %v784_v49 = vld [vmem:[%s2572_s15 + $0xe58] sm:$0xff]  ;;  %v1395_v54 = vadd.f32 %v1394_v37, %v809_v31  ;;  %v1232_v7 = vadd.f32 %v1231_v44, %v671_v45 }
 0x120   : > { %v1298_v28 = vadd.f32 %v1297_v12, %v727_v52  ;;  %v703_v55 = vld [vmem:[%s2572_s15 + $0xbd0] sm:$0xff]  ;;  %v732_v58 = vld [vmem:[%s2572_s15 + $0xcb8] sm:$0xff]  ;;  %v1364_v60 = vadd.f32 %v1363_v38, %v783_v35  ;;  %v758_v62 = vld [vmem:[%s2572_s15 + $0xd88] sm:$0xff]  ;;  %v1159_v12 = vadd.f32 %v1158_v50, %v608_v32  ;;  %v1196_v14 = vadd.f32 %v1195_v43, %v640_v39 }
 0x121   : > { %v1267_v36 = vadd.f32 %v1266_v27, %v701_v16  ;;  %v1331_v47 = vadd.f32 %v1330_v33, %v755_v25  ;;  %v731_v56 = vld [vmem:[%s2572_s15 + $0xcb0] sm:$0xff]  ;;  %v672_v61 = vld [vmem:[%s2572_s15 + $0xad8] sm:$0xff]  ;;  %v785_v1 = vld [vmem:[%s2572_s15 + $0xe60] sm:$0xff]  ;;  %v1396_v4 = vadd.f32 %v1395_v54, %v810_v42 }
 0x122   : > { %v1299_v0 = vadd.f32 %v1298_v28, %v728_v17  ;;  %v811_v51 = vld [vmem:[%s2572_s15 + $0xf30] sm:$0xff]  ;;  %v609_v52 = vld [vmem:[%s2572_s15 + $0x8e0] sm:$0xff]  ;;  %v812_v6 = vld [vmem:[%s2572_s15 + $0xf38] sm:$0xff]  ;;  %v1365_v2 = vadd.f32 %v1364_v60, %v784_v49  ;;  %v1233_v35 = vadd.f32 %v1232_v7, %v672_v61 }
 0x123   : > { %v1332_v59 = vadd.f32 %v1331_v47, %v756_v10  ;;  %v759_v63 = vld [vmem:[%s2572_s15 + $0xd90] sm:$0xff]  ;;  %v1268_v3 = vadd.f32 %v1267_v36, %v702_v40  ;;  %v1627_v9 = vld [vmem:[#allocation7] sm:$0xff]  ;;  %v1397_v16 = vadd.f32 %v1396_v4, %v811_v51  ;;  %v1630_v19 = vld [vmem:[#allocation7 + $0x18] sm:$0xff]  ;;  %v1160_v39 = vadd.f32 %v1159_v12, %v609_v52 }
 0x124   : > { %v1300_v53 = vadd.f32 %v1299_v0, %v729_v23  ;;  %v1628_v5 = vld [vmem:[#allocation7 + $0x8] sm:$0xff]  ;;  %v1629_v17 = vld [vmem:[#allocation7 + $0x10] sm:$0xff]  ;;  %v641_v11 = vld [vmem:[%s2572_s15 + $0x9e0] sm:$0xff]  ;;  %v1366_v22 = vadd.f32 %v1365_v2, %v785_v1 }
 0x125   : > { %v1333_v8 = vadd.f32 %v1332_v59, %v757_v48  ;;  %v786_v57 = vld [vmem:[%s2572_s15 + $0xe68] sm:$0xff]  ;;  %v733_v13 = vld [vmem:[%s2572_s15 + $0xcc0] sm:$0xff]  ;;  %v1976_v25 = vpack.c.bf16 %v1628_v5, %v1627_v9  ;;  %v704_v26 = vld [vmem:[%s2572_s15 + $0xbd8] sm:$0xff]  ;;  %v1269_v29 = vadd.f32 %v1268_v3, %v703_v55  ;;  %v1398_v23 = vadd.f32 %v1397_v16, %v812_v6 }
 0x126   : > { %v1301_v46 = vadd.f32 %v1300_v53, %v730_v41  ;;  %v813_v20 = vld [vmem:[%s2572_s15 + $0xf40] sm:$0xff]  ;;  %v760_v27 = vld [vmem:[%s2572_s15 + $0xd98] sm:$0xff]  ;;  %v787_v28 = vld [vmem:[%s2572_s15 + $0xe70] sm:$0xff]  ;;  %v1367_v0 = vadd.f32 %v1366_v22, %v786_v57  ;;  %v1979_v37 = vpack.c.bf16 %v1630_v19, %v1629_v17  ;;  %v1197_v40 = vadd.f32 %v1196_v14, %v641_v11 }
 0x127   : > { %v1334_v21 = vadd.f32 %v1333_v8, %v758_v62  ;;  %v673_v24 = vld [vmem:[%s2572_s15 + $0xae0] sm:$0xff]  ;;  %v610_v31 = vld [vmem:[%s2572_s15 + $0x8e8] sm:$0xff]  ;;  %1977 = vmatpush1.bf16.msra.mxu1 %v1976_v25  ;;  %v788_v32 = vld [vmem:[%s2572_s15 + $0xe78] sm:$0xff]  ;;  %v1399_v42 = vadd.f32 %v1398_v23, %v813_v20 }
 0x128   : > { %v1302_v15 = vadd.f32 %v1301_v46, %v731_v56  ;;  %v734_v33 = vld [vmem:[%s2572_s15 + $0xcc8] sm:$0xff]  ;;  %v761_v34 = vld [vmem:[%s2572_s15 + $0xda0] sm:$0xff]  ;;  %1978 = vmatprep.subr.bf16.mxu1 %v2336_v18  ;;  %v735_v45 = vld [vmem:[%s2572_s15 + $0xcd0] sm:$0xff]  ;;  %v1368_v50 = vadd.f32 %v1367_v0, %v787_v28  ;;  %v1270_v56 = vadd.f32 %v1269_v29, %v704_v26  ;;  %v1234_v62 = vadd.f32 %v1233_v35, %v673_v24 }
 0x129   : > { %v814_v10 = vld [vmem:[%s2572_s15 + $0xf48] sm:$0xff]  ;;  %v1335_v36 = vadd.f32 %v1334_v21, %v759_v63  ;;  %v815_v48 = vld [vmem:[%s2572_s15 + $0xf50] sm:$0xff]  ;;  %v705_v53 = vld [vmem:[%s2572_s15 + $0xbe0] sm:$0xff]  ;;  %v1161_v4 = vadd.f32 %v1160_v39, %v610_v31 }
 0x12a   : > { %v1303_v30 = vadd.f32 %v1302_v15, %v732_v58  ;;  %v1631_v44 = vld [vmem:[#allocation7 + $0x20] sm:$0xff]  ;;  %v1632_v47 = vld [vmem:[#allocation7 + $0x28] sm:$0xff]  ;;  %v1400_v51 = vadd.f32 %v1399_v42, %v814_v10  ;;  %v736_v59 = vld [vmem:[%s2572_s15 + $0xcd8] sm:$0xff]  ;;  %v1369_v1 = vadd.f32 %v1368_v50, %v788_v32  ;;  %v1271_v11 = vadd.f32 %v1270_v56, %v705_v53 }
 0x12b   : > { %v642_v38 = vld [vmem:[%s2572_s15 + $0x9e8] sm:$0xff]  ;;  %v1336_v49 = vadd.f32 %v1335_v36, %v760_v27  ;;  %v789_v55 = vld [vmem:[%s2572_s15 + $0xe80] sm:$0xff]  ;;  %v763_v60 = vld [vmem:[%s2572_s15 + $0xdb0] sm:$0xff]  ;;  %1980 = vmatpush1.bf16.msra.mxu1 %v1979_v37  ;;  %v1982_v3 = vpack.c.bf16 %v1632_v47, %v1631_v44 }
 0x12c   : > { %v1304_v41 = vadd.f32 %v1303_v30, %v733_v13  ;;  %v674_v43 = vld [vmem:[%s2572_s15 + $0xae8] sm:$0xff]  ;;  %v816_v61 = vld [vmem:[%s2572_s15 + $0xf58] sm:$0xff]  ;;  %v1198_v52 = vadd.f32 %v1197_v40, %v642_v38  ;;  %v1401_v7 = vadd.f32 %v1400_v51, %v815_v48  ;;  %1981 = vmatprep.subr.bf16.mxu1 %v2336_v18  ;;  %v611_v9 = vld [vmem:[%s2572_s15 + $0x8f0] sm:$0xff]  ;;  %v1370_v14 = vadd.f32 %v1369_v1, %v789_v55 }
 0x12d   : > { %v762_v54 = vld [vmem:[%s2572_s15 + $0xda8] sm:$0xff]  ;;  %v1337_v63 = vadd.f32 %v1336_v49, %v761_v34  ;;  %v1633_v8 = vld [vmem:[#allocation7 + $0x30] sm:$0xff]  ;;  %v1634_v2 = vld [vmem:[#allocation7 + $0x38] sm:$0xff]  ;;  %v1235_v24 = vadd.f32 %v1234_v62, %v674_v43  ;;  %v1162_v30 = vadd.f32 %v1161_v4, %v611_v9 }
 0x12e   : > { %v1305_v58 = vadd.f32 %v1304_v41, %v734_v33  ;;  %v790_v46 = vld [vmem:[%s2572_s15 + $0xe88] sm:$0xff]  ;;  %v643_v5 = vld [vmem:[%s2572_s15 + $0x9f0] sm:$0xff]  ;;  %v817_v57 = vld [vmem:[%s2572_s15 + $0xf60] sm:$0xff]  ;;  %v1402_v20 = vadd.f32 %v1401_v7, %v816_v61  ;;  %v1985_v28 = vpack.c.bf16 %v1634_v2, %v1633_v8 }
 0x12f   : > { %v1338_v12 = vadd.f32 %v1337_v63, %v762_v54  ;;  %v675_v15 = vld [vmem:[%s2572_s15 + $0xaf0] sm:$0xff]  ;;  %v737_v16 = vld [vmem:[%s2572_s15 + $0xce0] sm:$0xff]  ;;  %v764_v17 = vld [vmem:[%s2572_s15 + $0xdb8] sm:$0xff]  ;;  %v1371_v27 = vadd.f32 %v1370_v14, %v790_v46  ;;  %1983 = vmatpush1.bf16.msra.mxu1 %v1982_v3  ;;  %v1199_v23 = vadd.f32 %v1198_v52, %v643_v5 }
 0x130   : > { %v1306_v6 = vadd.f32 %v1305_v58, %v735_v45  ;;  %v791_v19 = vld [vmem:[%s2572_s15 + $0xe90] sm:$0xff]  ;;  %v706_v21 = vld [vmem:[%s2572_s15 + $0xbe8] sm:$0xff]  ;;  %v765_v22 = vld [vmem:[%s2572_s15 + $0xdc0] sm:$0xff]  ;;  %v1403_v31 = vadd.f32 %v1402_v20, %v817_v57  ;;  %1984 = vmatprep.subr.bf16.mxu1 %v2336_v18  ;;  %v1236_v49 = vadd.f32 %v1235_v24, %v675_v15 }
 0x131   : > { %v818_v25 = vld [vmem:[%s2572_s15 + $0xf68] sm:$0xff]  ;;  %v1339_v26 = vadd.f32 %v1338_v12, %v763_v60  ;;  %v792_v29 = vld [vmem:[%s2572_s15 + $0xe98] sm:$0xff]  ;;  %v819_v36 = vld [vmem:[%s2572_s15 + $0xf70] sm:$0xff]  ;;  %v1372_v32 = vadd.f32 %v1371_v27, %v791_v19  ;;  %v1272_v44 = vadd.f32 %v1271_v11, %v706_v21 }
 0x132   : > { %v1307_v13 = vadd.f32 %v1306_v6, %v736_v59  ;;  %v1635_v33 = vld [vmem:[#allocation7 + $0x40] sm:$0xff]  ;;  %v1636_v34 = vld [vmem:[#allocation7 + $0x48] sm:$0xff]  ;;  %v612_v10 = vld [vmem:[%s2572_s15 + $0x8f8] sm:$0xff]  ;;  %v1404_v47 = vadd.f32 %v1403_v31, %v818_v25 }
 0x133   : > { %v644_v35 = vld [vmem:[%s2572_s15 + $0x9f8] sm:$0xff]  ;;  %v1340_v37 = vadd.f32 %v1339_v26, %v764_v17  ;;  %v738_v40 = vld [vmem:[%s2572_s15 + $0xce8] sm:$0xff]  ;;  %v793_v42 = vld [vmem:[%s2572_s15 + $0xea0] sm:$0xff]  ;;  %v1373_v43 = vadd.f32 %v1372_v32, %v792_v29  ;;  %1986 = vmatpush1.bf16.msra.mxu1 %v1985_v28  ;;  %v1988_v53 = vpack.c.bf16 %v1636_v34, %v1635_v33  ;;  %v1163_v55 = vadd.f32 %v1162_v30, %v612_v10 }
 0x134   : > { %v1308_v0 = vadd.f32 %v1307_v13, %v737_v16  ;;  %v676_v39 = vld [vmem:[%s2572_s15 + $0xaf8] sm:$0xff]  ;;  %v766_v41 = vld [vmem:[%s2572_s15 + $0xdc8] sm:$0xff]  ;;  %v707_v38 = vld [vmem:[%s2572_s15 + $0xbf0] sm:$0xff]  ;;  %v1200_v56 = vadd.f32 %v1199_v23, %v644_v35  ;;  %v1405_v58 = vadd.f32 %v1404_v47, %v819_v36  ;;  %1987 = vmatprep.subr.bf16.mxu1 %v2336_v18 }
 0x135   : > { %v767_v45 = vld [vmem:[%s2572_s15 + $0xdd0] sm:$0xff]  ;;  %v820_v48 = vld [vmem:[%s2572_s15 + $0xf78] sm:$0xff]  ;;  %v1341_v50 = vadd.f32 %v1340_v37, %v765_v22  ;;  %v794_v54 = vld [vmem:[%s2572_s15 + $0xea8] sm:$0xff]  ;;  %v1374_v63 = vadd.f32 %v1373_v43, %v793_v42  ;;  %v1273_v4 = vadd.f32 %v1272_v44, %v707_v38  ;;  %v1237_v2 = vadd.f32 %v1236_v49, %v676_v39 }
 0x136   : > { %v1637_v51 = vld [vmem:[#allocation7 + $0x50] sm:$0xff]  ;;  %v1638_v59 = vld [vmem:[#allocation7 + $0x58] sm:$0xff]  ;;  %v1309_v61 = vadd.f32 %v1308_v0, %v738_v40  ;;  %v1406_v52 = vadd.f32 %v1405_v58, %v820_v48  ;;  %v822_v8 = vld [vmem:[%s2572_s15 + $0xf88] sm:$0xff]  ;;  %v1164_v14 = vrot.slane %v1163_v55, 4  ;;  %v1201_v15 = vrot.slane %v1200_v56, 4 }
 0x137   : > { %v821_v60 = vld [vmem:[%s2572_s15 + $0xf80] sm:$0xff]  ;;  %v1342_v62 = vadd.f32 %v1341_v50, %v766_v41  ;;  %v739_v1 = vld [vmem:[%s2572_s15 + $0xcf0] sm:$0xff]  ;;  %v768_v3 = vld [vmem:[%s2572_s15 + $0xdd8] sm:$0xff]  ;;  %v1375_v5 = vadd.f32 %v1374_v63, %v794_v54  ;;  %1989 = vmatpush1.bf16.msra.mxu1 %v1988_v53  ;;  %v1991_v57 = vpack.c.bf16 %v1638_v59, %v1637_v51  ;;  %v1238_v29 = vrot.slane %v1237_v2, 4 }
 0x138   : > { %v795_v46 = vld [vmem:[%s2572_s15 + $0xeb0] sm:$0xff]  ;;  %v708_v6 = vld [vmem:[%s2572_s15 + $0xbf8] sm:$0xff]  ;;  %v769_v7 = vld [vmem:[%s2572_s15 + $0xde0] sm:$0xff]  ;;  %v1407_v16 = vadd.f32 %v1406_v52, %v821_v60  ;;  %1990 = vmatprep.subr.bf16.mxu1 %v2336_v18  ;;  %v1310_v13 = vadd.f32 %v1309_v61, %v739_v1  ;;  %v1165_v10 = vadd.f32 %v1164_v14, %v1163_v55  ;;  %v1202_v35 = vadd.f32 %v1201_v15, %v1200_v56 }
 0x139   : > { %v1343_v9 = vadd.f32 %v1342_v62, %v767_v45  ;;  %v796_v12 = vld [vmem:[%s2572_s15 + $0xeb8] sm:$0xff]  ;;  %v1639_v17 = vld [vmem:[#allocation7 + $0x60] sm:$0xff]  ;;  %v1640_v19 = vld [vmem:[#allocation7 + $0x68] sm:$0xff]  ;;  %v1376_v21 = vadd.f32 %v1375_v5, %v795_v46  ;;  %v1274_v26 = vadd.f32 %v1273_v4, %v708_v6  ;;  %v1239_v38 = vadd.f32 %v1238_v29, %v1237_v2 }
 0x13a   : > { %v823_v11 = vld [vmem:[%s2572_s15 + $0xf90] sm:$0xff]  ;;  %v740_v22 = vld [vmem:[%s2572_s15 + $0xcf8] sm:$0xff]  ;;  %v770_v25 = vld [vmem:[%s2572_s15 + $0xde8] sm:$0xff]  ;;  %v1408_v27 = vadd.f32 %v1407_v16, %v822_v8  ;;  %v1994_v31 = vpack.c.bf16 %v1640_v19, %v1639_v17  ;;  %v1166_v50 = vrot.slane %v1165_v10, 2  ;;  %v1203_v43 = vrot.slane %v1202_v35, 2 }
 0x13b   : > { %v1344_v20 = vadd.f32 %v1343_v9, %v768_v3  ;;  %v797_v24 = vld [vmem:[%s2572_s15 + $0xec0] sm:$0xff]  ;;  %v824_v28 = vld [vmem:[%s2572_s15 + $0xf98] sm:$0xff]  ;;  %v1377_v23 = vadd.f32 %v1376_v21, %v796_v12  ;;  %1992 = vmatpush1.bf16.msra.mxu1 %v1991_v57  ;;  %v771_v33 = vld [vmem:[%s2572_s15 + $0xdf0] sm:$0xff]  ;;  %v1311_v37 = vadd.f32 %v1310_v13, %v740_v22  ;;  %v1275_v42 = vrot.slane %v1274_v26, 4 }
 0x13c   : > { %v798_v34 = vld [vmem:[%s2572_s15 + $0xec8] sm:$0xff]  ;;  %v1409_v36 = vadd.f32 %v1408_v27, %v823_v11  ;;  %1993 = vmatprep.subr.bf16.mxu1 %v2336_v18  ;;  %v825_v0 = vld [vmem:[%s2572_s15 + $0xfa0] sm:$0xff]  ;;  %v772_v40 = vld [vmem:[%s2572_s15 + $0xdf8] sm:$0xff]  ;;  %v1240_v62 = vrot.slane %v1239_v38, 2  ;;  %v1167_v3 = vadd.f32 %v1166_v50, %v1165_v10  ;;  %v1204_v46 = vadd.f32 %v1203_v43, %v1202_v35 }
 0x13d   : > { %v1345_v30 = vadd.f32 %v1344_v20, %v769_v7  ;;  %v1378_v39 = vadd.f32 %v1377_v23, %v797_v24  ;;  %v799_v41 = vld [vmem:[%s2572_s15 + $0xed0] sm:$0xff]  ;;  %v826_v47 = vld [vmem:[%s2572_s15 + $0xfa8] sm:$0xff]  ;;  %v800_v49 = vld [vmem:[%s2572_s15 + $0xed8] sm:$0xff]  ;;  %v1312_v55 = vrot.slane %v1311_v37, 4  ;;  %v1276_v59 = vadd.f32 %v1275_v42, %v1274_v26 }
 0x13e   : > { %v1410_v44 = vadd.f32 %v1409_v36, %v824_v28  ;;  %v827_v54 = vld [vmem:[%s2572_s15 + $0xfb0] sm:$0xff]  ;;  %v801_v51 = vld [vmem:[%s2572_s15 + $0xee0] sm:$0xff]  ;;  %v828_v61 = vld [vmem:[%s2572_s15 + $0xfb8] sm:$0xff]  ;;  %v1241_v12 = vadd.f32 %v1240_v62, %v1239_v38  ;;  %v1168_v16 = vrot.slane %v1167_v3, 1  ;;  %v1205_v17 = vrot.slane %v1204_v46, 1 }
 0x13f   : > { %v1346_v32 = vadd.f32 %v1345_v30, %v770_v25  ;;  %v1379_v48 = vadd.f32 %v1378_v39, %v798_v34  ;;  %1995 = vmatpush1.bf16.msra.mxu1 %v1994_v31  ;;  %v802_v1 = vld [vmem:[%s2572_s15 + $0xee8] sm:$0xff]  ;;  %v829_v6 = vld [vmem:[%s2572_s15 + $0xfc0] sm:$0xff]  ;;  %v1313_v7 = vadd.f32 %v1312_v55, %v1311_v37  ;;  %v803_v2 = vld [vmem:[%s2572_s15 + $0xef0] sm:$0xff]  ;;  %v1277_v9 = vrot.slane %v1276_v59, 2 }
 0x140   : > { %v1411_v53 = vadd.f32 %v1410_v44, %v825_v0  ;;  %1996 = vmatprep.subr.bf16.mxu1 %v2336_v18  ;;  %v830_v57 = vld [vmem:[%s2572_s15 + $0xfc8] sm:$0xff]  ;;  %v804_v15 = vld [vmem:[%s2572_s15 + $0xef8] sm:$0xff]  ;;  %v831_v13 = vld [vmem:[%s2572_s15 + $0xfd0] sm:$0xff]  ;;  %v1242_v26 = vrot.slane %v1241_v12, 1  ;;  %v1169_v28 = vadd.f32 %v1168_v16, %v1167_v3  ;;  %v1206_v29 = vadd.f32 %v1205_v17, %v1204_v46 }
 0x141   : > { %v1347_v45 = vadd.f32 %v1346_v32, %v771_v33  ;;  %v1380_v58 = vadd.f32 %v1379_v48, %v799_v41  ;;  %v1314_v20 = vrot.slane %v1313_v7, 2  ;;  %v1278_v22 = vadd.f32 %v1277_v9, %v1276_v59  ;;  %v832_v24 = vld [vmem:[%s2572_s15 + $0xfd8] sm:$0xff]  ;;  %v833_v31 = vld [vmem:[%s2572_s15 + $0xfe0] sm:$0xff]  ;;  %v834_v36 = vld [vmem:[%s2572_s15 + $0xfe8] sm:$0xff] }
 0x142   : > { %v1412_v60 = vadd.f32 %v1411_v53, %v826_v47  ;;  %v1243_v0 = vadd.f32 %v1242_v26, %v1241_v12  ;;  %v1438_v41 = vmul.f32 0.00390625, %v1206_v29  ;;  %v835_v42 = vld [vmem:[%s2572_s15 + $0xff0] sm:$0xff]  ;;  %v836_v48 = vld [vmem:[%s2572_s15 + $0xff8] sm:$0xff]  ;;  %v1643_v17 = vld [vmem:[#allocation7 + $0x80] sm:$0xff]  ;;  %v1520_v29 = vlaneseq  ;;  %s1777_s15 = sshll.u32 %s3077_s29, 4  ;;  %s3244_s15 = int_to_ptr.vmem [resolvable:$true] %s1777_s15 }
 0x143   : > { %v1348_v56 = vadd.f32 %v1347_v45, %v772_v40  ;;  %v1381_v63 = vadd.f32 %v1380_v58, %v800_v49  ;;  %v1315_v33 = vadd.f32 %v1314_v20, %v1313_v7  ;;  %v1279_v10 = vrot.slane %v1278_v22, 1  ;;  %v1646_v20 = vld [vmem:[#allocation7 + $0x98] sm:$0xff]  ;;  %v1649_v26 = vld [vmem:[#allocation7 + $0xb0] sm:$0xff]  ;;  %s2221_s8 = scalar_lea.vmem %s3244_s15, 256  ;;  %p2228_p3 = scmp.lt.s32.totalorder %s3244_s15, %s2226_s16 }
 0x144   : > { %v1413_v52 = vadd.f32 %v1412_v60, %v827_v54  ;;  %v1437_v40 = vmul.f32 0.00390625, %v1169_v28  ;;  %v1439_v50 = vmul.f32 0.00390625, %v1243_v0  ;;  %p2222_p1 = scmp.ne.s32.totalorder %s3244_s15, %s2221_s8  ;;  %p2229_p7 = scmp.lt.s32.totalorder %s2227_s12, %s2221_s8 }
 0x145   : > { %v1349_v4 = vrot.slane %v1348_v56, 4  ;;  %v1382_v8 = vadd.f32 %v1381_v63, %v801_v51  ;;  %v1316_v44 = vrot.slane %v1315_v33, 1  ;;  %v1280_v38 = vadd.f32 %v1279_v10, %v1278_v22  ;;  %v1647_v22 = vld [vmem:[#allocation7 + $0xa0] sm:$0xff] }
 0x146   : > { %v1414_v5 = vadd.f32 %v1413_v52, %v828_v61  ;;  %v1475_v54 = vsel %vm1461_vm0, %v1438_v41, %v1437_v40  ;;  %p2223_p4 = pnand %p2222_p1, %p2517_p6  ;;  %p2230_p10 = por %p2229_p7, %p2228_p3 }
 0x147   : > { %v1383_v14 = vadd.f32 %v1382_v8, %v802_v1  ;;  %v1350_v19 = vadd.f32 %v1349_v4, %v1348_v56  ;;  %v1317_v55 = vadd.f32 %v1316_v44, %v1315_v33  ;;  %v1440_v58 = vmul.f32 0.00390625, %v1280_v38 }
 0x148   : > { %v1415_v11 = vadd.f32 %v1414_v5, %v829_v6  ;;  %v1476_v59 = vsel %vm1463_vm1, %v1439_v50, %v1475_v54  ;;  %p2224_p8 = pneg %p2223_p4 }
 0x149   : > { %v1384_v21 = vadd.f32 %v1383_v14, %v803_v2  ;;  %v1351_v30 = vrot.slane %v1350_v19, 2  ;;  %v1441_v62 = vmul.f32 0.00390625, %v1317_v55  ;;  %v1477_v1 = vsel %vm1465_vm2, %v1440_v58, %v1476_v59  ;;  %v1641_v14 = vld [vmem:[#allocation7 + $0x70] sm:$0xff] }
 0x14a   : > { %v1416_v25 = vadd.f32 %v1415_v11, %v830_v57  ;;  %p2231_p13 = pnand %p2230_p10, %p2224_p8 }
 0x14b   : > { %v1385_v27 = vadd.f32 %v1384_v21, %v804_v15  ;;  %v1352_v32 = vadd.f32 %v1351_v30, %v1350_v19  ;;  %v1478_v52 = vsel %vm1467_vm3, %v1441_v62, %v1477_v1  ;;  %v1642_v15 = vld [vmem:[#allocation7 + $0x78] sm:$0xff]  ;;  %v1644_v19 = vld [vmem:[#allocation7 + $0x88] sm:$0xff]  ;;  %v1521_v30 = vshrl.u32 %v1520_v29, 7 }
 0x14c   : > { %v1417_v23 = vadd.f32 %v1416_v25, %v831_v13  ;;  %v1997_v16 = vpack.c.bf16 %v1642_v15, %v1641_v14  ;;  %v2000_v11 = vpack.c.bf16 %v1644_v19, %v1643_v17  ;;  %v1645_v13 = vld [vmem:[#allocation7 + $0x90] sm:$0xff]  ;;  %v1648_v25 = vld [vmem:[#allocation7 + $0xa8] sm:$0xff] }
 0x14d   : > { %v1386_v34 = vrot.slane %v1385_v27, 4  ;;  %v1353_v43 = vrot.slane %v1352_v32, 1  ;;  %v2003_v21 = vpack.c.bf16 %v1646_v20, %v1645_v13  ;;  %v1526_v33 = vsub.s32 1, %v1521_v30 }
 0x14e   : > { %v1418_v35 = vadd.f32 %v1417_v23, %v832_v24  ;;  %1998 = vmatpush1.bf16.msra.mxu1 %v1997_v16  ;;  %v2006_v24 = vpack.c.bf16 %v1648_v25, %v1647_v22  ;;  %v1522_v23 = vsub.s32 0, %v1521_v30 }
 0x14f   : > { %v1387_v37 = vadd.f32 %v1386_v34, %v1385_v27  ;;  %v1354_v60 = vadd.f32 %v1353_v43, %v1352_v32  ;;  %1999 = vmatprep.subr.bf16.mxu1 %v2336_v18  ;;  %v1650_v27 = vld [vmem:[#allocation7 + $0xb8] sm:$0xff] }
 0x150   : > { %v1419_v39 = vadd.f32 %v1418_v35, %v833_v31  ;;  %v2009_v28 = vpack.c.bf16 %v1650_v27, %v1649_v26  ;;  %v1518_v31 = vld [vmem:[#allocation5] sm:$0x3] }
 0x151   : > { %v1388_v47 = vrot.slane %v1387_v37, 2  ;;  %v1442_v4 = vmul.f32 0.00390625, %v1354_v60  ;;  %v1523_v34 = vrot.slane %v1518_v31, %v1522_v23  ;;  %v1527_v10 = vrot.slane %v1518_v31, %v1526_v33 }
 0x152   : > { %v1420_v45 = vadd.f32 %v1419_v39, %v834_v36  ;;  %2001 = vmatpush1.bf16.msra.mxu1 %v2000_v11 }
 0x153   : > { %v1389_v49 = vadd.f32 %v1388_v47, %v1387_v37  ;;  %v1479_v2 = vsel %vm1469_vm4, %v1442_v4, %v1478_v52  ;;  %2002 = vmatprep.subr.bf16.mxu1 %v2336_v18 }
 0x154   : > { %v1421_v53 = vadd.f32 %v1420_v45, %v835_v42 }
 0x155   : > { %v1390_v51 = vrot.slane %v1389_v49, 1 }
 0x156   : > { %v1422_v56 = vadd.f32 %v1421_v53, %v836_v48  ;;  %2004 = vmatpush1.bf16.msra.mxu1 %v2003_v21 }
 0x157   : > { %v1391_v3 = vadd.f32 %v1390_v51, %v1389_v49  ;;  %2005 = vmatprep.subr.bf16.mxu1 %v2336_v18 }
 0x158   : > { %v1423_v61 = vrot.slane %v1422_v56, 4 }
 0x159   : > { %v1443_v7 = vmul.f32 0.00390625, %v1391_v3 }
 0x15a   : > { %v1424_v63 = vadd.f32 %v1423_v61, %v1422_v56  ;;  %2007 = vmatpush1.bf16.msra.mxu1 %v2006_v24 }
 0x15b   : > { %v1480_v5 = vsel %vm1471_vm5, %v1443_v7, %v1479_v2  ;;  %2008 = vmatprep.subr.bf16.mxu1 %v2336_v18 }
 0x15c   : > { %v1425_v46 = vrot.slane %v1424_v63, 2 }
 0x15e   : > { %v1426_v6 = vadd.f32 %v1425_v46, %v1424_v63  ;;  %2010 = vmatpush1.bf16.msra.mxu1 %v2009_v28 }
 0x160   : > { %v1427_v8 = vrot.slane %v1426_v6, 1 }
 0x162   : > { %v1428_v9 = vadd.f32 %v1427_v8, %v1426_v6 }
 0x164   : > { %v1444_v57 = vmul.f32 0.00390625, %v1428_v9 }
 0x166   : > { %v1481_v12 = vsel %vm1473_vm6, %v1444_v57, %v1480_v5 }
 0x167   : > { %1485 = vst [vmem:[%s3077_s29 + $0x8] sm:$0xff] %v1481_v12  ;;  %1601 = vmatmul.mubr.f32.gmra.mrb[2].mxu0 %v1481_v12 }
 0x1e8   : > { %v1596_v35 = vpop.f32.mrb[0].mxu0 }
 0x1e9   : > { %v1597_v36 = vadd.f32 %v1596_v35, %v1523_v34  ;;  %v1598_v0 = vpop.f32.mrb[1].mxu0 }
 0x1ea   : > { %v1599_v37 = vadd.f32 %v1598_v0, %v1527_v10 }
 0x1eb   : > { %v1611_v32 = vmul.f32 0.70710677, %v1597_v36  ;;  %v1607_v47 = vmul.f32 0.5, %v1597_v36 }
 0x1ec   : > { %v1612_v39 = vmul.f32 0.70710677, %v1599_v37  ;;  %v1608_v42 = vmul.f32 0.5, %v1599_v37 }
 0x1ed   : > { %2099 = verf.f32 %v1611_v32 }
 0x1ee   : > { %2101 = verf.f32 %v1612_v39 }
 0x1f7   : > { %v2100_v18 = vpop.eup %2099 }
 0x1f8   : > { %v2102_v40 = vpop.eup %2101  ;;  %v1619_v41 = vadd.f32 1.0, %v2100_v18 }
 0x1f9   : > { %v1620_v44 = vadd.f32 1.0, %v2102_v40 }
 0x1fa   : > { %v1623_v45 = vmul.f32 %v1619_v41, %v1607_v47 }
 0x1fb   : > { %v1624_v38 = vmul.f32 %v1620_v44, %v1608_v42 }
 0x1fd   : > { %1929 = vmatprep.mubr.msk.f32.mxu1 %vm1658_vm7, %v1624_v38 }
 0x1fe   : > { %1730 = vmatmul.mubr.f32.vlgmr.msra.gmra.mrb[0].mxu1 %v1623_v45 }
 0x23a   : > { %v1602_v48 = vpop.f32.mrb[2].mxu0 }
 0x23b   : > { %v1603_v49 = vadd.f32 %v1602_v48, %v1523_v34  ;;  %v1604_v50 = vpop.f32.mrb[3].mxu0 }
 0x23c   : > { %v1605_v43 = vadd.f32 %v1604_v50, %v1527_v10 }
 0x23d   : > { %v1613_v53 = vmul.f32 0.70710677, %v1603_v49  ;;  %v1609_v60 = vmul.f32 0.5, %v1603_v49 }
 0x23e   : > { %v1614_v54 = vmul.f32 0.70710677, %v1605_v43  ;;  %v1610_v51 = vmul.f32 0.5, %v1605_v43 }
 0x23f   : > { %2103 = verf.f32 %v1613_v53 }
 0x240   : > { %2105 = verf.f32 %v1614_v54 }
 0x249   : > { %v2104_v55 = vpop.eup %2103 }
 0x24a   : > { %v2106_v56 = vpop.eup %2105  ;;  %v1621_v58 = vadd.f32 1.0, %v2104_v55 }
 0x24b   : > { %v1622_v59 = vadd.f32 1.0, %v2106_v56 }
 0x24c   : > { %v1625_v62 = vmul.f32 %v1621_v58, %v1609_v60 }
 0x24d   : > { %v1626_v61 = vmul.f32 %v1622_v59, %v1610_v51 }
 0x24f   : > { %1930 = vmatprep.mubr.msk.f32.mxu1 %vm1658_vm7, %v1626_v61 }
 0x250   : > { %1735 = vmatmul.mubr.f32.gmra.mrb[2].mxu1 %v1625_v62 }
 0x251   : > { %2234 = shalt.err (!%p2231_p13)
}
 0x252   : > { %s2235_s19 = scalar_lea.hbm %s3251_s7, 256  ;;  %s2239_s27 = scalar_lea.hbm %s3342_s6, 512 }
 0x253   : > { %p2236_p0 = scmp.ne.s32.totalorder %s3251_s7, %s2235_s19  ;;  %p2240_p9 = scmp.lt.u32.totalorder %s3251_s7, %s3342_s6 }
 0x254   : > { %p2241_p12 = scmp.lt.u32.totalorder %s2239_s27, %s2235_s19  ;;  %p2243_p1 = scmp.lt.u32.totalorder %s2235_s19, %s3251_s7 }
 0x255   : > { %p2237_p5 = pnand %p2236_p0, %p2517_p6 }
 0x256   : > { %p2242_p2 = por %p2241_p12, %p2240_p9 }
 0x257   : > { %p2238_p11 = pneg %p2237_p5 }
 0x258   : > { %p2244_p4 = por %p2243_p1, %p2242_p2 }
 0x25a   : > { %p2245_p8 = pnand %p2244_p4, %p2238_p11 }
 0x25c   : > { %2248 = shalt.err (!%p2245_p8)
}
 0x25d   : > { %s2338_s8 = smov 128   ;;  %s2339_s16 = smov 8   ;;  %v1928_v63 = vld [vmem:[#allocation8] ss:$0 sm:$0xff] }
 0x25e   : > { %2026 = dma.vmem_to_hbm [thread:$0]  (%p2517_p6), %s3244_s15, 256, %s3251_s7, %s1748_s30, %s2338_s8, %s2338_s8, %s2339_s16  }
 0x25f   : > { %s314_s12 = scalar_lea.vmem [#allocation10], %s1926_s9  ;;  %s3289_s7 = scalar_lea.hbm %s3341_s5, %s1941_s20 }
 0x260   : > { %s1761_s19 = sshll.u32 %s314_s12, 4  ;;  %s1743_s30 = scalar_lea.sflag [#allocation4], %s2568_s10  ;;  %s3282_s19 = int_to_ptr.vmem [resolvable:$true] %s1761_s19 }
 0x261   : > { %s2249_s29 = scalar_lea.vmem %s3282_s19, 256  ;;  %s2340_s9 = smov [#allocation10]  }
 0x262   : > { %p2250_p3 = scmp.ne.s32.totalorder %s3282_s19, %s2249_s29  ;;  %s2253_s27 = sshll.u32 %s2340_s9, 4  ;;  %s2254_s27 = int_to_ptr.vmem [resolvable:$false] %s2253_s27 }
 0x263   : > { %s2255_s26 = scalar_lea.vmem %s2254_s27, 512  ;;  %p2256_p13 = scmp.lt.s32.totalorder %s3282_s19, %s2254_s27 }
 0x264   : > { %p2251_p7 = pnand %p2250_p3, %p2517_p6  ;;  %p2257_p0 = scmp.lt.s32.totalorder %s2255_s26, %s2249_s29 }
 0x266   : > { %p2252_p10 = pneg %p2251_p7  ;;  %p2258_p5 = por %p2257_p0, %p2256_p13 }
 0x268   : > { %p2259_p11 = pnand %p2258_p5, %p2252_p10 }
 0x2d1   : > { %v1731_v1 = vpop.f32.mrb[0].mxu1 }
 0x2d2   : > { %v1732_v3 = vadd.f32 %v1928_v63, %v1731_v1  ;;  %v1733_v46 = vpop.f32.mrb[1].mxu1 }
 0x2d4   : > { %1740 = vst [vmem:[%s314_s12] sm:$0xff] %v1732_v3 }
 0x323   : > { %v1736_v4 = vpop.f32.mrb[2].mxu1 }
 0x324   : > { %v1737_v52 = vadd.f32 %v1928_v63, %v1736_v4  ;;  %v1738_v6 = vpop.f32.mrb[3].mxu1 }
 0x326   : > { %1741 = vst [vmem:[%s314_s12 + $0x8] sm:$0xff] %v1737_v52 }
 0x327   : > { %2262 = shalt.err (!%p2259_p11)
}
 0x328   : > { %s2263_s25 = scalar_lea.hbm %s3289_s7, 256  ;;  %s2267_s12 = scalar_lea.hbm %s3341_s5, 512 }
 0x329   : > { %p2264_p9 = scmp.ne.s32.totalorder %s3289_s7, %s2263_s25  ;;  %p2268_p1 = scmp.lt.u32.totalorder %s3289_s7, %s3341_s5 }
 0x32a   : > { %p2269_p4 = scmp.lt.u32.totalorder %s2267_s12, %s2263_s25  ;;  %p2271_p3 = scmp.lt.u32.totalorder %s2263_s25, %s3289_s7 }
 0x32b   : > { %p2265_p12 = pnand %p2264_p9, %p2517_p6 }
 0x32c   : > { %p2270_p8 = por %p2269_p4, %p2268_p1 }
 0x32d   : > { %p2266_p2 = pneg %p2265_p12 }
 0x32e   : > { %p2272_p7 = por %p2271_p3, %p2270_p8 }
 0x330   : > { %p2273_p10 = pnand %p2272_p7, %p2266_p2 }
 0x332   : > { %2276 = shalt.err (!%p2273_p10)
}
 0x333   : > { %2025 = dma.vmem_to_hbm [thread:$0]  (%p2517_p6), %s3282_s19, 256, %s3289_s7, %s1743_s30, %s2338_s8, %s2338_s8, %s2339_s16  }
 0x334 PF: > { %s1792_s29 = sand.u32 1, %s2315_s21   ;;  %p3360_p13 = scmp.ne.s32.totalorder %s3347_s28, 0 }
 0x335   : > { %p3361_p0 = scmp.ge.s32.totalorder %s2327_s24, 2  ;;  %s1793_s9 = scalar_lea.sflag [#allocation4], %s1792_s29 }
 0x337   : > { %p2044_p5 = pnand %p3361_p0, %p3360_p13 }
 0x339   : > { %2306 = dma.done.wait (!%p2044_p5), %s1793_s9, 256  }
 0x33a   : > { %2308 = vsyncadd (!%p2044_p5), %s1793_s9, 4294967040  ;;  %s1802_s14 = scalar_lea.sflag [#allocation12], %s1792_s29 }
 0x33b   : > { %2310 = dma.done.wait (!%p2044_p5), %s1802_s14, 256  }
 0x33c   : > { %2312 = vsyncadd (!%p2044_p5), %s1802_s14, 4294967040  ;;  %p25_p6 = scmp.ge.s32.totalorder %s2503_s18, 4   ;;  %s3362_s21 = smov %s2319_s22 }
 0x33d   : > { %s3363_s22 = smov %s2323_s23  ;;  %s3364_s23 = smov %s2513_s13 }
 0x33e   : > { %s3365_s24 = smov %s2503_s18  ;;  %27 = sbr.rel (!%p25_p6) target bundleno = 9 (0x9), region = 114 }
 0x345   :  { %1807 = vsyncpa [#allocation3], 1 }
 0x346   :  { %1809 = vsyncpa [#allocation3 + $0x1], 1 }
 0x347   :  { %1810 = vsyncpa [#allocation6], 1 }
 0x348   :  { %1811 = vsyncpa [#allocation9], 1 }
 0x349   :  { %1812 = vsyncpa [#allocation4], 1 }
 0x34a   :  { %1814 = vsyncpa [#allocation4 + $0x1], 1 }
 0x34b   :  { %1815 = vsyncpa [#allocation12], 1 }
 0x34c   :  { %1817 = vsyncpa [#allocation12 + $0x1], 1 }

</bundles_post_ra>
